<compile_context>
chip_gen: v6e
topology: v6e:2x2x1
jax: 0.10.0
libtpu: 0.0.40
codegen_flags: <defaults>
</compile_context>

<pallas_src>
import functools
import math

import jax
import jax.numpy as jnp
from jax.experimental import pallas as pl
from jax.experimental.pallas import tpu as pltpu


def _mam_kernel(x_ref, pcs_ref, ptaps_ref, b1_ref, o_ref, *,
                img_h, img_w, channels, cr):
    """Fused MAMLayer forward for a block of NB samples.

    x_ref:     (NB*C, S)   f32, S = H*W flattened onto lanes
    pcs_ref:   (C, 2*Cr+1) packed [W1^T | W2 | (b2 + b_csd)]
    ptaps_ref: (NB*C, 9)   depthwise 3x3 weights, tap-major, tiled over NB
    b1_ref:    (1, Cr)     conv_du[0].bias
    o_ref:     (NB*C, S)
    """
    xb = x_ref[...].astype(jnp.float32)
    nbc, S = xb.shape
    nb = nbc // channels
    H, W = img_h, img_w

    # ---- per (sample, channel) spatial variance (torch.var, unbiased ddof=1) ----
    # Two-pass centered form for exact torch.var parity (no cancellation risk).
    mean = jnp.sum(xb, axis=1, keepdims=True) * (1.0 / S)                 # (NBC, 1)
    cent = xb - mean
    var = jnp.sum(cent * cent, axis=1, keepdims=True) * (1.0 / (S - 1))   # (NBC, 1)

    # ---- F.normalize(var, p=2, dim=1): L2 over channels within each sample ----
    var3 = var.reshape(nb, channels, 1)                                   # tiny
    nrm = jnp.sqrt(jnp.sum(var3 * var3, axis=1, keepdims=True))           # (NB,1,1)
    vnorm3 = var3 / jnp.maximum(nrm, 1e-12)                               # (NB,C,1)

    # ---- channel-attention MLP (two 1x1 convs) on the tiny (NB, C) tensor ----
    w1t = pcs_ref[:, 0:cr]                  # (C, Cr)
    w2 = pcs_ref[:, cr:2 * cr]              # (C, Cr)
    bsum = pcs_ref[:, 2 * cr:2 * cr + 1]    # (C, 1) = b2 + b_csd (pre-summed)
    h = jnp.sum(vnorm3 * w1t, axis=1) + b1_ref[...]                       # (NB, Cr)
    h = jnp.maximum(h, 0.0)
    ca3 = jnp.sum(w2 * h[:, None, :], axis=2, keepdims=True)              # (NB,C,1)
    # Fold every per-channel term into one (NB*C, 1) bias added once per element.
    bias_rows = (vnorm3 + ca3 + bsum).reshape(nbc, 1)

    # ---- boundary masks from a (1, S) iota (grid-invariant, sublane-broadcast) ----
    lane = jax.lax.broadcasted_iota(jnp.int32, (1, S), 1)
    colm = lane % W
    not_first_col = colm != 0              # valid sources for dw = +1 taps
    not_last_col = colm != (W - 1)         # valid sources for dw = -1 taps
    not_top_row = lane >= W                # valid outputs for dh = -1 taps
    not_bot_row = lane < (H - 1) * W       # valid outputs for dh = +1 taps

    # Pre-mask the source once per horizontal shift (2 selects total, not 6).
    x_dwm1 = jnp.where(not_last_col, xb, 0.0)
    x_dwp1 = jnp.where(not_first_col, xb, 0.0)

    # ---- depthwise 3x3 conv (padding=1, groups=C) via 9 XLU rolls ----
    acc = None
    for dh in (-1, 0, 1):
        part = None
        for dw in (-1, 0, 1):
            k = (dh + 1) * 3 + (dw + 1)
            s = dh * W + dw                                  # flattened tap offset
            src = x_dwm1 if dw == -1 else (x_dwp1 if dw == 1 else xb)
            # tap[i] = src[(i + s) mod S]  ->  roll by (-s) mod S (jnp.roll semantics)
            tap = src if s == 0 else pltpu.roll(src, (-s) % S, axis=1)
            term = tap * ptaps_ref[:, k:k + 1]               # (NBC,1) bcast weight
            part = term if part is None else part + term
        if dh == -1:
            part = jnp.where(not_top_row, part, 0.0)         # kill row-0 wraparound
        elif dh == 1:
            part = jnp.where(not_bot_row, part, 0.0)         # kill last-row wraparound
        acc = part if acc is None else acc + part

    # ---- gate: sigmoid(vnorm + ca + csd) and modulate ----
    z = acc + bias_rows
    z = jnp.maximum(z, -60.0)              # keep exp finite so the recip is NaN-free
    t = jnp.exp(-z)                        # EUP
    denom = 1.0 + t
    r = pl.reciprocal(denom, approx=True)  # EUP seed
    y = r * (2.0 - denom * r)              # one Newton step -> ~f32-accurate sigmoid
    o_ref[...] = (xb * y).astype(o_ref.dtype)


def _pick_nb(n, channels, per_sample_bytes, target_bytes=1 << 20):
    """Samples per grid step: ~1 MiB input block, grid >= 2 when possible,
    divides N, and keeps the sublane dim (NB*C) 8-aligned."""
    cap = max(1, target_bytes // max(per_sample_bytes, 1))
    if n > 1:
        cap = min(cap, (n + 1) // 2)       # keep >= 2 grid steps for v7x's two TCs
    best = None
    for d in range(1, n + 1):
        if n % d:
            continue
        if (d * channels) % 8 and d != n:
            continue
        if d <= cap:
            best = d
    return best if best is not None else n


def mam_layer_forward(x, w_du1, b_du1, w_du2, b_du2, w_csd, b_csd):
    """MAMLayer.forward with PyTorch parameter layouts.

    x:      (N, C, H, W) float32
    w_du1:  (C//r, C, 1, 1), b_du1: (C//r,)   -- conv_du[0] (1x1, bias)
    w_du2:  (C, C//r, 1, 1), b_du2: (C,)      -- conv_du[2] (1x1, bias)
    w_csd:  (C, 1, 3, 3),    b_csd: (C,)      -- depthwise 3x3, groups=C, bias
    """
    N, C, H, W = x.shape
    Cr = w_du1.shape[0]
    S = H * W
    if S < 2:
        raise ValueError("MAMLayer variance (ddof=1) needs H*W >= 2")

    x_flat = x.reshape(N * C, S)                     # contiguous reshape (free)

    nb = _pick_nb(N, C, C * S * x.dtype.itemsize)
    grid = N // nb

    # TODO(synk): S-tiled two-pass path for huge feature maps is not implemented.
    if nb * C * S * 4 > (6 << 20):
        raise NotImplementedError("per-block working set too large; needs S tiling")

    # Pack per-channel params into one lane-padded slab + tiled tap weights + b1.
    w1t = w_du1.reshape(Cr, C).T.astype(jnp.float32)             # (C, Cr)
    w2m = w_du2.reshape(C, Cr).astype(jnp.float32)               # (C, Cr)
    bsum = (b_du2 + b_csd).reshape(C, 1).astype(jnp.float32)     # (C, 1)
    pcs = jnp.concatenate([w1t, w2m, bsum], axis=1)              # (C, 2*Cr+1)
    b1r = b_du1.reshape(1, Cr).astype(jnp.float32)               # (1, Cr)
    taps = jnp.tile(w_csd.reshape(C, 9).astype(jnp.float32), (nb, 1))  # (nb*C, 9)

    kernel = functools.partial(_mam_kernel, img_h=H, img_w=W, channels=C, cr=Cr)

    flops = N * C * S * 34                            # taps + variance + gate
    transcendentals = N * C * S                       # sigmoid exp
    bytes_accessed = 4 * (2 * N * C * S + pcs.size + b1r.size + taps.size)

    out_flat = pl.pallas_call(
        kernel,
        out_shape=jax.ShapeDtypeStruct((N * C, S), x.dtype),
        grid_spec=pltpu.PrefetchScalarGridSpec(
            num_scalar_prefetch=0,
            grid=(grid,),
            in_specs=[
                pl.BlockSpec((nb * C, S), lambda i: (i, 0)),         # x block
                pl.BlockSpec((C, 2 * Cr + 1), lambda i: (0, 0)),     # packed params
                pl.BlockSpec((nb * C, 9), lambda i: (0, 0)),         # 3x3 taps
                pl.BlockSpec((1, Cr), lambda i: (0, 0)),             # b1
            ],
            out_specs=pl.BlockSpec((nb * C, S), lambda i: (i, 0)),
        ),
        compiler_params=pltpu.CompilerParams(
            dimension_semantics=("parallel",),
        ),
        cost_estimate=pl.CostEstimate(
            flops=flops,
            transcendentals=transcendentals,
            bytes_accessed=bytes_accessed,
        ),
    )(x_flat, pcs, taps, b1r)

    return out_flat.reshape(N, C, H, W)


def _mam_reference(x, w_du1, b_du1, w_du2, b_du2, w_csd, b_csd):
    """Pure-JAX reference matching the PyTorch module (f32, HIGHEST precision)."""
    N, C, H, W = x.shape
    Cr = w_du1.shape[0]
    var = jnp.var(x, axis=(2, 3), ddof=1, keepdims=True)               # (N,C,1,1)
    nrm = jnp.sqrt(jnp.sum(var * var, axis=1, keepdims=True))
    vnorm = var / jnp.maximum(nrm, 1e-12)
    v = vnorm[:, :, 0, 0]                                              # (N, C)
    h = jnp.einsum("nc,rc->nr", v, w_du1.reshape(Cr, C),
                   precision=jax.lax.Precision.HIGHEST) + b_du1
    h = jnp.maximum(h, 0.0)
    ca = jnp.einsum("nr,cr->nc", h, w_du2.reshape(C, Cr),
                    precision=jax.lax.Precision.HIGHEST) + b_du2
    ca = ca[:, :, None, None]
    csd = jax.lax.conv_general_dilated(
        x, w_csd, window_strides=(1, 1), padding=[(1, 1), (1, 1)],
        dimension_numbers=("NCHW", "OIHW", "NCHW"),
        feature_group_count=C,
        precision=jax.lax.Precision.HIGHEST,
    ) + b_csd.reshape(1, C, 1, 1)
    y = jax.nn.sigmoid(vnorm + ca + csd)
    return x * y


if __name__ == "__main__":
    # MAMLayer(channels=32, reduction=16): C -> 2 -> C channel MLP on the
    # normalized per-channel variance, plus a depthwise 3x3 spatial term.
    N, C, H, W = 2, 32, 16, 16
    reduction = 16
    Cr = C // reduction

    key = jax.random.PRNGKey(0)
    ks = jax.random.split(key, 7)
    x = jax.random.normal(ks[0], (N, C, H, W), dtype=jnp.float32)

    def uni(k, shape, fan_in):
        bound = 1.0 / math.sqrt(fan_in)
        return jax.random.uniform(k, shape, jnp.float32, -bound, bound)

    # Deterministic synthetic params (Kaiming-uniform-like bounds).
    w_du1 = uni(ks[1], (Cr, C, 1, 1), C)      # conv_du[0].weight
    b_du1 = uni(ks[2], (Cr,), C)              # conv_du[0].bias
    w_du2 = uni(ks[3], (C, Cr, 1, 1), Cr)     # conv_du[2].weight
    b_du2 = uni(ks[4], (C,), Cr)              # conv_du[2].bias
    w_csd = uni(ks[5], (C, 1, 3, 3), 9)       # csd.weight (depthwise)
    b_csd = uni(ks[6], (C,), 9)               # csd.bias

    out = mam_layer_forward(x, w_du1, b_du1, w_du2, b_du2, w_csd, b_csd)
    out = jax.block_until_ready(out)

    ref = _mam_reference(x, w_du1, b_du1, w_du2, b_du2, w_csd, b_csd)
    assert out.shape == x.shape, out.shape
    max_err = float(jnp.max(jnp.abs(out - ref)))
    assert jnp.allclose(out, ref, atol=1e-4, rtol=1e-4), max_err

    print("KERNEL_OK")
</pallas_src>

<mosaic_0001>
module attributes {stable_mosaic.version = 11 : i64} {
  func.func @_mam_kernel(%arg0: i32, %arg1: memref<32x256xf32, #tpu.memory_space<vmem>>, %arg2: memref<32x5xf32, #tpu.memory_space<vmem>>, %arg3: memref<32x9xf32, #tpu.memory_space<vmem>>, %arg4: memref<1x2xf32, #tpu.memory_space<vmem>>, %arg5: memref<32x256xf32, #tpu.memory_space<vmem>>) attributes {dimension_semantics = [#tpu.dimension_semantics<parallel>], iteration_bounds = array<i64: 2>, scalar_prefetch = 0 : i64, scratch_operands = 0 : i64, tpu.core_type = #tpu.core_type<tc>, window_params = [{transform_indices = @transform_0, window_bounds = array<i64: 32, 256>}, {pipeline_mode = #tpu.pipeline_mode<synchronous>, transform_indices = @transform_1, window_bounds = array<i64: 32, 5>}, {pipeline_mode = #tpu.pipeline_mode<synchronous>, transform_indices = @transform_2, window_bounds = array<i64: 32, 9>}, {pipeline_mode = #tpu.pipeline_mode<synchronous>, transform_indices = @transform_3, window_bounds = array<i64: 1, 2>}, {transform_indices = @transform_4, window_bounds = array<i64: 32, 256>}]} {
    %c0 = arith.constant 0 : index
    %c0_0 = arith.constant 0 : index
    %0 = vector.load %arg1[%c0, %c0_0] : memref<32x256xf32, #tpu.memory_space<vmem>>, vector<32x256xf32>
    %cst = arith.constant dense<0.000000e+00> : vector<32xf32>
    %1 = vector.multi_reduction <add>, %0, %cst [1] : vector<32x256xf32> to vector<32xf32>
    %2 = vector.shape_cast %1 : vector<32xf32> to vector<32x1xf32>
    %cst_1 = arith.constant 3.906250e-03 : f32
    %3 = vector.broadcast %cst_1 : f32 to vector<32x1xf32>
    %4 = arith.mulf %2, %3 : vector<32x1xf32>
    %5 = vector.broadcast %4 : vector<32x1xf32> to vector<32x256xf32>
    %6 = arith.subf %0, %5 : vector<32x256xf32>
    %7 = arith.mulf %6, %6 : vector<32x256xf32>
    %cst_2 = arith.constant dense<0.000000e+00> : vector<32xf32>
    %8 = vector.multi_reduction <add>, %7, %cst_2 [1] : vector<32x256xf32> to vector<32xf32>
    %9 = vector.shape_cast %8 : vector<32xf32> to vector<32x1xf32>
    %cst_3 = arith.constant 0.00392156886 : f32
    %10 = vector.broadcast %cst_3 : f32 to vector<32x1xf32>
    %11 = arith.mulf %9, %10 : vector<32x1xf32>
    %12 = vector.shape_cast %11 : vector<32x1xf32> to vector<1x32x1xf32>
    %13 = arith.mulf %12, %12 : vector<1x32x1xf32>
    %cst_4 = arith.constant dense<0.000000e+00> : vector<1x1xf32>
    %14 = vector.multi_reduction <add>, %13, %cst_4 [1] : vector<1x32x1xf32> to vector<1x1xf32>
    %15 = vector.shape_cast %14 : vector<1x1xf32> to vector<1x1x1xf32>
    %16 = math.sqrt %15 : vector<1x1x1xf32>
    %cst_5 = arith.constant 9.99999996E-13 : f32
    %17 = vector.broadcast %cst_5 : f32 to vector<1x1x1xf32>
    %18 = arith.maximumf %16, %17 : vector<1x1x1xf32>
    %19 = vector.broadcast %18 : vector<1x1x1xf32> to vector<1x32x1xf32>
    %20 = arith.divf %12, %19 : vector<1x32x1xf32>
    %c0_6 = arith.constant 0 : index
    %c0_7 = arith.constant 0 : index
    %21 = vector.load %arg2[%c0_6, %c0_7] : memref<32x5xf32, #tpu.memory_space<vmem>>, vector<32x2xf32>
    %c0_8 = arith.constant 0 : index
    %c2 = arith.constant 2 : index
    %22 = vector.load %arg2[%c0_8, %c2] : memref<32x5xf32, #tpu.memory_space<vmem>>, vector<32x2xf32>
    %c0_9 = arith.constant 0 : index
    %c4 = arith.constant 4 : index
    %23 = vector.load %arg2[%c0_9, %c4] : memref<32x5xf32, #tpu.memory_space<vmem>>, vector<32x1xf32>
    %24 = vector.shape_cast %21 : vector<32x2xf32> to vector<1x32x2xf32>
    %25 = vector.broadcast %20 : vector<1x32x1xf32> to vector<1x32x2xf32>
    %26 = arith.mulf %25, %24 : vector<1x32x2xf32>
    %cst_10 = arith.constant dense<0.000000e+00> : vector<1x2xf32>
    %27 = vector.multi_reduction <add>, %26, %cst_10 [1] : vector<1x32x2xf32> to vector<1x2xf32>
    %c0_11 = arith.constant 0 : index
    %c0_12 = arith.constant 0 : index
    %28 = vector.load %arg4[%c0_11, %c0_12] : memref<1x2xf32, #tpu.memory_space<vmem>>, vector<1x2xf32>
    %29 = arith.addf %27, %28 : vector<1x2xf32>
    %cst_13 = arith.constant 0.000000e+00 : f32
    %30 = vector.broadcast %cst_13 : f32 to vector<1x2xf32>
    %31 = arith.maximumf %29, %30 : vector<1x2xf32>
    %32 = vector.shape_cast %31 : vector<1x2xf32> to vector<1x1x2xf32>
    %33 = vector.shape_cast %22 : vector<32x2xf32> to vector<1x32x2xf32>
    %34 = vector.broadcast %32 : vector<1x1x2xf32> to vector<1x32x2xf32>
    %35 = arith.mulf %33, %34 : vector<1x32x2xf32>
    %cst_14 = arith.constant dense<0.000000e+00> : vector<1x32xf32>
    %36 = vector.multi_reduction <add>, %35, %cst_14 [2] : vector<1x32x2xf32> to vector<1x32xf32>
    %37 = vector.shape_cast %36 : vector<1x32xf32> to vector<1x32x1xf32>
    %38 = arith.addf %20, %37 : vector<1x32x1xf32>
    %39 = vector.shape_cast %23 : vector<32x1xf32> to vector<1x32x1xf32>
    %40 = arith.addf %38, %39 : vector<1x32x1xf32>
    %41 = vector.shape_cast %40 : vector<1x32x1xf32> to vector<32x1xf32>
    %42 = tpu.iota {dimensions = array<i32: 1>} : vector<1x256xi32>
    %c16_i32 = arith.constant 16 : i32
    %c0_i32 = arith.constant 0 : i32
    %43 = arith.cmpi eq, %c16_i32, %c0_i32 : i32
    %c1_i32 = arith.constant 1 : i32
    %44 = arith.select %43, %c1_i32, %c16_i32 : i32
    %45 = vector.broadcast %44 : i32 to vector<1x256xi32>
    %46 = arith.remsi %42, %45 : vector<1x256xi32>
    %c0_i32_15 = arith.constant 0 : i32
    %47 = vector.broadcast %c0_i32_15 : i32 to vector<1x256xi32>
    %48 = arith.cmpi ne, %46, %47 : vector<1x256xi32>
    %c0_i32_16 = arith.constant 0 : i32
    %49 = vector.broadcast %c0_i32_16 : i32 to vector<1x256xi32>
    %50 = arith.cmpi slt, %46, %49 : vector<1x256xi32>
    %c0_i32_17 = arith.constant 0 : i32
    %51 = arith.cmpi slt, %44, %c0_i32_17 : i32
    %52 = vector.broadcast %51 : i1 to vector<1x256xi1>
    %53 = vector.broadcast %52 : vector<1x256xi1> to vector<1x256xi1>
    %54 = arith.xori %50, %53 : vector<1x256xi1>
    %55 = arith.andi %54, %48 : vector<1x256xi1>
    %56 = vector.broadcast %44 : i32 to vector<1x256xi32>
    %57 = arith.addi %46, %56 : vector<1x256xi32>
    %58 = arith.select %55, %57, %46 : vector<1x256xi1>, vector<1x256xi32>
    %c0_i32_18 = arith.constant 0 : i32
    %59 = vector.broadcast %c0_i32_18 : i32 to vector<1x256xi32>
    %60 = arith.cmpi ne, %58, %59 : vector<1x256xi32>
    %c15_i32 = arith.constant 15 : i32
    %61 = vector.broadcast %c15_i32 : i32 to vector<1x256xi32>
    %62 = arith.cmpi ne, %58, %61 : vector<1x256xi32>
    %c16_i32_19 = arith.constant 16 : i32
    %63 = vector.broadcast %c16_i32_19 : i32 to vector<1x256xi32>
    %64 = arith.cmpi sge, %42, %63 : vector<1x256xi32>
    %c240_i32 = arith.constant 240 : i32
    %65 = vector.broadcast %c240_i32 : i32 to vector<1x256xi32>
    %66 = arith.cmpi slt, %42, %65 : vector<1x256xi32>
    %cst_20 = arith.constant 0.000000e+00 : f32
    %67 = vector.shape_cast %62 : vector<1x256xi1> to vector<1x256xi1>
    %68 = vector.broadcast %67 : vector<1x256xi1> to vector<32x256xi1>
    %69 = vector.broadcast %cst_20 : f32 to vector<32x256xf32>
    %70 = arith.select %68, %0, %69 : vector<32x256xi1>, vector<32x256xf32>
    %cst_21 = arith.constant 0.000000e+00 : f32
    %71 = vector.shape_cast %60 : vector<1x256xi1> to vector<1x256xi1>
    %72 = vector.broadcast %71 : vector<1x256xi1> to vector<32x256xi1>
    %73 = vector.broadcast %cst_21 : f32 to vector<32x256xf32>
    %74 = arith.select %72, %0, %73 : vector<32x256xi1>, vector<32x256xf32>
    %c17_i32 = arith.constant 17 : i32
    %75 = tpu.dynamic_rotate %70 by %c17_i32 dim 1 : vector<32x256xf32>, i32 -> vector<32x256xf32>
    %c0_22 = arith.constant 0 : index
    %c0_23 = arith.constant 0 : index
    %76 = vector.load %arg3[%c0_22, %c0_23] : memref<32x9xf32, #tpu.memory_space<vmem>>, vector<32x1xf32>
    %77 = vector.broadcast %76 : vector<32x1xf32> to vector<32x256xf32>
    %78 = arith.mulf %75, %77 : vector<32x256xf32>
    %c16_i32_24 = arith.constant 16 : i32
    %79 = tpu.dynamic_rotate %0 by %c16_i32_24 dim 1 : vector<32x256xf32>, i32 -> vector<32x256xf32>
    %c0_25 = arith.constant 0 : index
    %c1 = arith.constant 1 : index
    %80 = vector.load %arg3[%c0_25, %c1] : memref<32x9xf32, #tpu.memory_space<vmem>>, vector<32x1xf32>
    %81 = vector.broadcast %80 : vector<32x1xf32> to vector<32x256xf32>
    %82 = arith.mulf %79, %81 : vector<32x256xf32>
    %83 = arith.addf %78, %82 : vector<32x256xf32>
    %c15_i32_26 = arith.constant 15 : i32
    %84 = tpu.dynamic_rotate %74 by %c15_i32_26 dim 1 : vector<32x256xf32>, i32 -> vector<32x256xf32>
    %c0_27 = arith.constant 0 : index
    %c2_28 = arith.constant 2 : index
    %85 = vector.load %arg3[%c0_27, %c2_28] : memref<32x9xf32, #tpu.memory_space<vmem>>, vector<32x1xf32>
    %86 = vector.broadcast %85 : vector<32x1xf32> to vector<32x256xf32>
    %87 = arith.mulf %84, %86 : vector<32x256xf32>
    %88 = arith.addf %83, %87 : vector<32x256xf32>
    %cst_29 = arith.constant 0.000000e+00 : f32
    %89 = vector.shape_cast %64 : vector<1x256xi1> to vector<1x256xi1>
    %90 = vector.broadcast %89 : vector<1x256xi1> to vector<32x256xi1>
    %91 = vector.broadcast %cst_29 : f32 to vector<32x256xf32>
    %92 = arith.select %90, %88, %91 : vector<32x256xi1>, vector<32x256xf32>
    %c1_i32_30 = arith.constant 1 : i32
    %93 = tpu.dynamic_rotate %70 by %c1_i32_30 dim 1 : vector<32x256xf32>, i32 -> vector<32x256xf32>
    %c0_31 = arith.constant 0 : index
    %c3 = arith.constant 3 : index
    %94 = vector.load %arg3[%c0_31, %c3] : memref<32x9xf32, #tpu.memory_space<vmem>>, vector<32x1xf32>
    %95 = vector.broadcast %94 : vector<32x1xf32> to vector<32x256xf32>
    %96 = arith.mulf %93, %95 : vector<32x256xf32>
    %c0_32 = arith.constant 0 : index
    %c4_33 = arith.constant 4 : index
    %97 = vector.load %arg3[%c0_32, %c4_33] : memref<32x9xf32, #tpu.memory_space<vmem>>, vector<32x1xf32>
    %98 = vector.broadcast %97 : vector<32x1xf32> to vector<32x256xf32>
    %99 = arith.mulf %0, %98 : vector<32x256xf32>
    %100 = arith.addf %96, %99 : vector<32x256xf32>
    %c255_i32 = arith.constant 255 : i32
    %101 = tpu.dynamic_rotate %74 by %c255_i32 dim 1 : vector<32x256xf32>, i32 -> vector<32x256xf32>
    %c0_34 = arith.constant 0 : index
    %c5 = arith.constant 5 : index
    %102 = vector.load %arg3[%c0_34, %c5] : memref<32x9xf32, #tpu.memory_space<vmem>>, vector<32x1xf32>
    %103 = vector.broadcast %102 : vector<32x1xf32> to vector<32x256xf32>
    %104 = arith.mulf %101, %103 : vector<32x256xf32>
    %105 = arith.addf %100, %104 : vector<32x256xf32>
    %106 = arith.addf %92, %105 : vector<32x256xf32>
    %c241_i32 = arith.constant 241 : i32
    %107 = tpu.dynamic_rotate %70 by %c241_i32 dim 1 : vector<32x256xf32>, i32 -> vector<32x256xf32>
    %c0_35 = arith.constant 0 : index
    %c6 = arith.constant 6 : index
    %108 = vector.load %arg3[%c0_35, %c6] : memref<32x9xf32, #tpu.memory_space<vmem>>, vector<32x1xf32>
    %109 = vector.broadcast %108 : vector<32x1xf32> to vector<32x256xf32>
    %110 = arith.mulf %107, %109 : vector<32x256xf32>
    %c240_i32_36 = arith.constant 240 : i32
    %111 = tpu.dynamic_rotate %0 by %c240_i32_36 dim 1 : vector<32x256xf32>, i32 -> vector<32x256xf32>
    %c0_37 = arith.constant 0 : index
    %c7 = arith.constant 7 : index
    %112 = vector.load %arg3[%c0_37, %c7] : memref<32x9xf32, #tpu.memory_space<vmem>>, vector<32x1xf32>
    %113 = vector.broadcast %112 : vector<32x1xf32> to vector<32x256xf32>
    %114 = arith.mulf %111, %113 : vector<32x256xf32>
    %115 = arith.addf %110, %114 : vector<32x256xf32>
    %c239_i32 = arith.constant 239 : i32
    %116 = tpu.dynamic_rotate %74 by %c239_i32 dim 1 : vector<32x256xf32>, i32 -> vector<32x256xf32>
    %c0_38 = arith.constant 0 : index
    %c8 = arith.constant 8 : index
    %117 = vector.load %arg3[%c0_38, %c8] : memref<32x9xf32, #tpu.memory_space<vmem>>, vector<32x1xf32>
    %118 = vector.broadcast %117 : vector<32x1xf32> to vector<32x256xf32>
    %119 = arith.mulf %116, %118 : vector<32x256xf32>
    %120 = arith.addf %115, %119 : vector<32x256xf32>
    %cst_39 = arith.constant 0.000000e+00 : f32
    %121 = vector.shape_cast %66 : vector<1x256xi1> to vector<1x256xi1>
    %122 = vector.broadcast %121 : vector<1x256xi1> to vector<32x256xi1>
    %123 = vector.broadcast %cst_39 : f32 to vector<32x256xf32>
    %124 = arith.select %122, %120, %123 : vector<32x256xi1>, vector<32x256xf32>
    %125 = arith.addf %106, %124 : vector<32x256xf32>
    %126 = vector.broadcast %41 : vector<32x1xf32> to vector<32x256xf32>
    %127 = arith.addf %125, %126 : vector<32x256xf32>
    %cst_40 = arith.constant -6.000000e+01 : f32
    %128 = vector.broadcast %cst_40 : f32 to vector<32x256xf32>
    %129 = arith.maximumf %127, %128 : vector<32x256xf32>
    %cst_41 = arith.constant 0.000000e+00 : f32
    %130 = vector.broadcast %cst_41 : f32 to vector<32x256xf32>
    %131 = arith.subf %130, %129 : vector<32x256xf32>
    %132 = math.exp %131 : vector<32x256xf32>
    %cst_42 = arith.constant 1.000000e+00 : f32
    %133 = vector.broadcast %cst_42 : f32 to vector<32x256xf32>
    %134 = arith.addf %133, %132 : vector<32x256xf32>
    %135 = tpu.reciprocal %134 {approx = true} : vector<32x256xf32> -> vector<32x256xf32>
    %136 = arith.mulf %134, %135 : vector<32x256xf32>
    %cst_43 = arith.constant 2.000000e+00 : f32
    %137 = vector.broadcast %cst_43 : f32 to vector<32x256xf32>
    %138 = arith.subf %137, %136 : vector<32x256xf32>
    %139 = arith.mulf %135, %138 : vector<32x256xf32>
    %140 = arith.mulf %0, %139 : vector<32x256xf32>
    %c0_44 = arith.constant 0 : index
    %c0_45 = arith.constant 0 : index
    %141 = vector.load %arg5[%c0_44, %c0_45] : memref<32x256xf32, #tpu.memory_space<vmem>>, vector<32x256xf32>
    tpu.vector_store %arg5[%c0_44, %c0_45], %140 {strides = array<i32>} : memref<32x256xf32, #tpu.memory_space<vmem>>, vector<32x256xf32>,
    return
  }
  func.func @transform_0(%arg0: i32) -> (i32, i32) {
    %c0_i32 = arith.constant 0 : i32
    %c0_i32_0 = arith.constant 0 : i32
    return %arg0, %c0_i32 : i32, i32
  }
  func.func @transform_1(%arg0: i32) -> (i32, i32) {
    %c0_i32 = arith.constant 0 : i32
    %c0_i32_0 = arith.constant 0 : i32
    %c0_i32_1 = arith.constant 0 : i32
    return %c0_i32, %c0_i32_0 : i32, i32
  }
  func.func @transform_2(%arg0: i32) -> (i32, i32) {
    %c0_i32 = arith.constant 0 : i32
    %c0_i32_0 = arith.constant 0 : i32
    %c0_i32_1 = arith.constant 0 : i32
    return %c0_i32, %c0_i32_0 : i32, i32
  }
  func.func @transform_3(%arg0: i32) -> (i32, i32) {
    %c0_i32 = arith.constant 0 : i32
    %c0_i32_0 = arith.constant 0 : i32
    %c0_i32_1 = arith.constant 0 : i32
    return %c0_i32, %c0_i32_0 : i32, i32
  }
  func.func @transform_4(%arg0: i32) -> (i32, i32) {
    %c0_i32 = arith.constant 0 : i32
    %c0_i32_0 = arith.constant 0 : i32
    return %arg0, %c0_i32 : i32, i32
  }
}

</mosaic_0001>

<bundles_post_ra>
// kernel: tpu_custom_call.1
= control target key start
LH: loop header
LB: loop body
LE: loop exit
PB: predicated region body
PF: predicated region fallthrough
CT: control target
= control target key end

     0   :  { %9 = vsyncpa [#allocation3], 0  ;;  %s2344_s0 = inlined_call_operand.hbm [shape: f32[64,256], index: 0, kind: input, shape index: {}]   ;;  %s2345_s1 = inlined_call_operand.vmem [shape: f32[32,5], index: 1, kind: input, shape index: {}]   ;;  %s2346_s2 = inlined_call_operand.vmem [shape: f32[32,9], index: 2, kind: input, shape index: {}]   ;;  %s2347_s3 = inlined_call_operand.vmem [shape: f32[1,2], index: 3, kind: input, shape index: {}]   ;;  %s2348_s4 = inlined_call_operand.hbm [shape: f32[64,256], index: 4, kind: output, shape index: {}]  }
   0x1   :  { %11 = vsyncpa [#allocation3 + $0x1], 0 }
   0x2   :  { %12 = vsyncpa [#allocation4], 0 }
   0x3   :  { %14 = vsyncpa [#allocation4 + $0x1], 0  ;;  %s1443_s15 = smov 0   ;;  %s1445_s16 = smov 0  }
   0x4   :  { %s1447_s17 = smov 0   ;;  %s1449_s18 = smov 0  }
   0x5 LB: > { %s1464_s19 = sadd.s32 4294967295, %s1392_s18   ;;  %s1149_s20 = sadd.s32 4294967294, %s1392_s18   ;;  %s1392_s18 = sphi %s1449_s18, %s2419_s18   ;;  %s1388_s17 = sphi %s1447_s17, %s2418_s17   ;;  %s1384_s16 = sphi %s1445_s16, %s2417_s16   ;;  %s1380_s15 = sphi %s1443_s15, %s2416_s15  }
   0x6   : > { %s1468_s21 = sadd.s32 1, %s1392_s18   ;;  %s27_s22 = sadd.s32 1, %s1388_s17 }
   0x7   : > { %s24_s23 = ssub.s32 %s1392_s18, %s1468_s21  ;;  %p34_p0 = scmp.ne.s32.totalorder %s1388_s17, %s1384_s16 }
   0x8   : > { %p25_p1 = scmp.eq.s32.totalorder %s24_s23, 0  ;;  %p35_p2 = scmp.eq.s32.totalorder %s1392_s18, 0 }
   0x9   : > { %p40_p3 = scmp.ne.s32.totalorder %s1384_s16, %s1380_s15  ;;  %p41_p4 = scmp.eq.s32.totalorder %s1464_s19, 0 }
   0xa   : > { %s1480_s24 = scalar_select %p25_p1, %s1388_s17, %s27_s22  }
   0xb   : > { %p1482_p5 = por %p35_p2, %p34_p0  ;;  %p1486_p6 = por %p41_p4, %p40_p3 }
   0xc   : > { %p127_p7 = scmp.eq.s32.totalorder %s1464_s19, 1  ;;  %p133_p8 = scmp.eq.s32.totalorder %s1149_s20, 1 }
   0xd   : > { %s2373_s26 = scalar_select %p1486_p6, 1, 0 }
   0xe   : > { %p1181_p10 = scmp.lt.s32.totalorder %s1392_s18, 2  ;;  %p1493_p11 = por %p127_p7, %p34_p0 }
   0xf   : > { %p1497_p12 = por %p133_p8, %p40_p3  ;;  %s162_s29 = sand.u32 1, %s1388_s17  }
  0x10   : > { %s2374_s27 = scalar_select %p1493_p11, 1, 0 }
  0x11   : > { %s2375_s28 = scalar_select %p1497_p12, 1, 0 }
  0x12   : > { %s1166_s30 = sshll.u32 %s1392_s18, 10  ;;  %s1152_s5 = sshll.u32 %s162_s29, 6 }
  0x13   : > { %s1506_s8 = scalar_lea.hbm %s2344_s0, %s1166_s30  ;;  %s166_s9 = scalar_lea.vmem [#allocation2], %s1152_s5 }
  0x14   : > { %s174_s10 = sshll.u32 %s166_s9, 4  ;;  %p1510_p13 = pnand %p1181_p10, %p1482_p5  ;;  %s1514_s10 = int_to_ptr.vmem [resolvable:$true] %s174_s10 }
  0x15   : > { %s1516_s12 = scalar_lea.sflag [#allocation3], %s162_s29  ;;  %s1300_s13 = scalar_lea.hbm %s1506_s8, 1024 }
  0x16   : > { %p1301_p0 = scmp.ne.s32.totalorder %s1506_s8, %s1300_s13  ;;  %p1302_p1 = pneg %p1510_p13 }
  0x17   : > { %s1305_s22 = scalar_lea.hbm %s2344_s0, 2048  ;;  %p1306_p4 = scmp.lt.s32.totalorder %s1506_s8, %s2344_s0 }
  0x18   : > { %p1303_p2 = pnand %p1302_p1, %p1301_p0  ;;  %p1307_p5 = scmp.lt.s32.totalorder %s1305_s22, %s1300_s13 }
  0x1a   : > { %p1304_p3 = pneg %p1303_p2  ;;  %p1308_p7 = por %p1307_p5, %p1306_p4 }
  0x1c   : > { %p1309_p8 = pnand %p1308_p7, %p1304_p3 }
  0x1e   : > { %1312 = shalt.err (!%p1309_p8)
}
  0x1f   : > { %s1313_s29 = scalar_lea.vmem %s1514_s10, 1024  ;;  %s1394_s30 = smov [#allocation2]  }
  0x20   : > { %p1314_p10 = scmp.ne.s32.totalorder %s1514_s10, %s1313_s29  ;;  %s1318_s5 = sshll.u32 %s1394_s30, 4  ;;  %s1319_s5 = int_to_ptr.vmem [resolvable:$false] %s1318_s5 }
  0x21   : > { %s1320_s6 = scalar_lea.vmem %s1319_s5, 2048  ;;  %p1321_p2 = scmp.lt.s32.totalorder %s1514_s10, %s1319_s5 }
  0x22   : > { %p1316_p9 = pnand %p1314_p10, %p1302_p1  ;;  %p1322_p12 = scmp.lt.s32.totalorder %s1320_s6, %s1313_s29 }
  0x24   : > { %p1317_p0 = pneg %p1316_p9  ;;  %p1323_p11 = por %p1322_p12, %p1321_p2 }
  0x26   : > { %p1324_p6 = pnand %p1323_p11, %p1317_p0 }
  0x28   : > { %1327 = shalt.err (!%p1324_p6)
}
  0x29   : > { %s1395_s7 = smov 256   ;;  %s1396_s9 = smov 16  }
  0x2a   : > { %1176 = dma.hbm_to_vmem [thread:$0]  (!%p1510_p13), %s1506_s8, 1024, %s1514_s10, %s1516_s12, %s1395_s7, %s1395_s7, %s1396_s9  }
  0x2b   : > { %p1156_p9 = scmp.ge.s32.totalorder %s1392_s18, 1  ;;  %p182_p1 = scmp.lt.s32.totalorder %s1392_s18, 3 }
  0x2d   : > { %p183_p3 = pnand %p1156_p9, %p182_p1 }
  0x2f   : > { %186 = sbr.rel (%p183_p3) target bundleno = 1004 (0x3ec), region = 36 }
  0x34   : > { %s1540_s13 = sand.u32 1, %s1384_s16   ;;  %p2377_p6 = scmp.ne.s32.totalorder %s2373_s26, 0 }
  0x35   : > { %s1157_s14 = sshll.u32 %s1540_s13, 6  ;;  %s189_s20 = scalar_lea.sflag [#allocation3], %s1540_s13 }
  0x36   : > { %s1546_s22 = scalar_lea.vmem [#allocation2], %s1157_s14 }
  0x37   : > { %1371 = dma.done.wait (%p2377_p6), %s189_s20, 1024  }
  0x38   : > { %1373 = vsyncadd (%p2377_p6), %s189_s20, 4294966272  ;;  %v1553_v0 = vld [vmem:[%s1546_s22] sm:$0xff]  ;;  %v1556_v1 = vld [vmem:[%s1546_s22 + $0x8] sm:$0xff]  ;;  %v1397_v12 = vmov 0   ;;  %v2355_v41 = vlaneseq  ;;  %s1398_s26 = smov 17   ;;  %s1399_s23 = smov 16  }
  0x39   : > { %v1559_v2 = vld [vmem:[%s1546_s22 + $0x20] sm:$0xff]  ;;  %v227_v3 = vadd.f32 %v1556_v1, %v1553_v0  ;;  %v1564_v4 = vld [vmem:[%s1546_s22 + $0x28] sm:$0xff]  ;;  %v1567_v5 = vld [vmem:[%s1546_s22 + $0x10] sm:$0xff]  ;;  %1237 = vset.pattern.permute.xlu1 %v1397_v12  ;;  %1238 = vset.pattern.permute.xlu0 %v1397_v12  ;;  %v1400_v56 = vmov 1   ;;  %s1401_s6 = smov 15   ;;  %v1402_v62 = vmov 2  }
  0x3a   : > { %v1570_v6 = vld [vmem:[%s1546_s22 + $0x18] sm:$0xff]  ;;  %v233_v7 = vadd.f32 %v1564_v4, %v1559_v2  ;;  %v1575_v8 = vld [vmem:[%s1546_s22 + $0x30] sm:$0xff]  ;;  %v1593_v42 = vand.u32 127, %v2355_v41  ;;  %v1630_v53 = vld [vmem:[%s2346_s2 + $0x8] sm:$0xff]  ;;  %s1403_s7 = smov 1   ;;  %s1406_s9 = smov 127  }
  0x3b   : > { %2378 = vst [vmem:[#allocation8_spill] sm:$0xff] %v1570_v6  ;;  %v1578_v9 = vld [vmem:[%s1546_s22 + $0x38] sm:$0xff]  ;;  %228 = vadd.xlane.f32.xlu0 %v227_v3  ;;  %v230_v10 = vadd.f32 %v1570_v6, %v1567_v5  ;;  %v1641_v55 = vld [vmem:[%s2346_s2] sm:$0xff]  ;;  %v1649_v57 = vld [vmem:[%s2346_s2 + $0x10] sm:$0xff]  ;;  %vm309_vm9 = vcmask 15360   ;;  %s1414_s20 = smov 112  }
  0x3c   : > { %234 = vadd.xlane.f32.xlu1 %v233_v7  ;;  %v236_v11 = vadd.f32 %v1578_v9, %v1575_v8  ;;  %v381_v43 = vand.u32 15, %v1593_v42  ;;  %v1597_v44 = vadd.s32 128, %v1593_v42  ;;  %v1657_v58 = vld [vmem:[%s2346_s2 + $0x18] sm:$0xff]  ;;  %vm449_vm4 = vcmp.lt.s32.totalorder %v1593_v42, 17  ;;  %s2277_s8 = scalar_lea.vmem [#allocation5], %s1157_s14  ;;  %s1168_s14 = sshll.u32 %s1464_s19, 10 }
  0x3d   : > { %vm506_vm5 = vcmp.lt.s32.totalorder %v1593_v42, 16  ;;  %vm563_vm8 = vcmp.lt.s32.totalorder %v1593_v42, 15  ;;  %vm632_vm10 = vcmp.lt.s32.totalorder %v1593_v42, 1  ;;  %vm713_vm11 = vcmp.lt.s32.totalorder %v1593_v42, 127  ;;  %s1076_s10 = sshll.u32 %s2277_s8, 4  ;;  %s2295_s25 = scalar_lea.hbm %s2348_s4, %s1168_s14  ;;  %s2298_s10 = int_to_ptr.vmem [resolvable:$true] %s1076_s10 }
  0x3e   : > { %2379 = vst [vmem:[#allocation9_spill] sm:$0xff] %v1597_v44  ;;  %vm403_vm0 = vcmp.ne.s32.totalorder %v381_v43, 15  ;;  %v388_v46 = vand.u32 15, %v1597_v44  ;;  %vm1667_vm2 = vcmp.ne.s32.totalorder %v381_v43, 0  ;;  %vm405_vm12 = vcmp.ge.s32.totalorder %v1593_v42, 16  ;;  %s1062_s19 = scalar_lea.sflag [#allocation4], %s1540_s13 }
  0x3f   : > { %231 = vadd.xlane.f32.xlu0 %v230_v10  ;;  %v1600_v45 = vsel %vm403_vm0, %v1553_v0, 0.0  ;;  %v1604_v47 = vsel %vm403_vm0, %v1567_v5, 0.0  ;;  %v1608_v48 = vsel %vm403_vm0, %v1559_v2, 0.0  ;;  %v1616_v50 = vsel %vm403_vm0, %v1575_v8, 0.0  ;;  %s1328_s29 = scalar_lea.vmem %s2298_s10, 1024  ;;  %p2413_p12 = scmp.ne.s32.totalorder %s2374_s27, 0 }
  0x40   : > { %237 = vadd.xlane.f32.xlu1 %v236_v11  ;;  %vm404_vm1 = vcmp.ne.s32.totalorder %v388_v46, 15  ;;  %2381 = vst [vmem:[#allocation11_spill] sm:$0xff] %v1616_v50  ;;  %v1677_v60 = vsel %vm1667_vm2, %v1567_v5, 0.0  ;;  %v1685_v61 = vsel %vm1667_vm2, %v1575_v8, 0.0  ;;  %vm1687_vm3 = vcmp.ne.s32.totalorder %v388_v46, 0  ;;  %p1329_p11 = scmp.ne.s32.totalorder %s2298_s10, %s1328_s29  ;;  %s1416_s30 = smov [#allocation5]  }
  0x41   : > { %v1612_v49 = vsel %vm404_vm1, %v1570_v6, 0.0  ;;  %v1620_v51 = vsel %vm404_vm1, %v1578_v9, 0.0  ;;  %v1624_v52 = vsel %vm404_vm1, %v1556_v1, 0.0  ;;  %v1634_v54 = vsel %vm404_vm1, %v1564_v4, 0.0  ;;  %2385 = vst [vmem:[#allocation13_spill] sm:$0xff] %v1677_v60  ;;  %2386 = vst [vmem:[#allocation14_spill] sm:$0xff] %v1685_v61 }
  0x42   : > { %2380 = vst [vmem:[#allocation10_spill] sm:$0xff] %v1612_v49  ;;  %2382 = vst [vmem:[#allocation12_spill] sm:$0xff] %v1620_v51  ;;  %v1697_v3 = vsel %vm1687_vm3, %v1570_v6, 0.0  ;;  %v1704_v7 = vsel %vm1687_vm3, %v1578_v9, 0.0  ;;  %v1710_v10 = vsel %vm1667_vm2, %v1553_v0, 0.0  ;;  %v1717_v11 = vsel %vm1667_vm2, %v1559_v2, 0.0  ;;  %p1330_p13 = pnand %p1329_p11, %p2413_p12 }
  0x43   : > { %2389 = vst [vmem:[#allocation15_spill] sm:$0xff] %v1697_v3  ;;  %2390 = vst [vmem:[#allocation16_spill] sm:$0xff] %v1704_v7  ;;  %v1724_v12 = vsel %vm1687_vm3, %v1556_v1, 0.0  ;;  %vm827_vm13 = vcmp.lt.s32.totalorder %v1593_v42, 112  ;;  %vm778_vm14 = vcmp.lt.s32.totalorder %v1593_v42, 113  ;;  %vm884_vm15 = vcmp.lt.s32.totalorder %v1593_v42, 111 }
  0x44   : > { %p1331_p4 = pneg %p1330_p13  ;;  %s1332_s5 = sshll.u32 %s1416_s30, 4  ;;  %s1333_s5 = int_to_ptr.vmem [resolvable:$false] %s1332_s5 }
  0x45   : > { %p1335_p5 = scmp.lt.s32.totalorder %s2298_s10, %s1333_s5 }
  0xc4   : > { %v229_v13 = vpop.xlane.xlu0 %228 }
  0xc5   : > { %v239_v14 = vmul.f32 0.00390625, %v229_v13  ;;  %v235_v15 = vpop.xlane.xlu1 %234  ;;  %v1404_v13 = vmov 3  }
  0xc6   : > { %v241_v16 = vmul.f32 0.00390625, %v235_v15  ;;  %v2351_v15 = vmov 4  }
  0xc7   : > { %v243_v17 = vsub.f32 %v1553_v0, %v239_v14  ;;  %v244_v18 = vsub.f32 %v1556_v1, %v239_v14  ;;  %v1732_v14 = vsel %vm1687_vm3, %v1564_v4, 0.0 }
  0xc8   : > { %v247_v19 = vsub.f32 %v1559_v2, %v241_v16  ;;  %v248_v20 = vsub.f32 %v1564_v4, %v241_v16  ;;  %v232_v21 = vpop.xlane.xlu0 %231 }
  0xc9   : > { %v240_v22 = vmul.f32 0.00390625, %v232_v21  ;;  %v238_v23 = vpop.xlane.xlu1 %237  ;;  %v251_v24 = vmul.f32 %v243_v17, %v243_v17  ;;  %v252_v25 = vmul.f32 %v244_v18, %v244_v18 }
  0xca   : > { %v242_v26 = vmul.f32 0.00390625, %v238_v23  ;;  %v255_v27 = vmul.f32 %v247_v19, %v247_v19  ;;  %v256_v28 = vmul.f32 %v248_v20, %v248_v20 }
  0xcb   : > { %v245_v29 = vsub.f32 %v1567_v5, %v240_v22  ;;  %v246_v30 = vsub.f32 %v1570_v6, %v240_v22  ;;  %v259_v31 = vadd.f32 %v252_v25, %v251_v24 }
  0xcc   : > { %v249_v32 = vsub.f32 %v1575_v8, %v242_v26  ;;  %v250_v33 = vsub.f32 %v1578_v9, %v242_v26  ;;  %v265_v34 = vadd.f32 %v256_v28, %v255_v27 }
  0xcd   : > { %260 = vadd.xlane.f32.xlu0 %v259_v31  ;;  %v253_v35 = vmul.f32 %v245_v29, %v245_v29  ;;  %v254_v36 = vmul.f32 %v246_v30, %v246_v30  ;;  %v2353_v29 = vmov 5  }
  0xce   : > { %v257_v37 = vmul.f32 %v249_v32, %v249_v32  ;;  %v258_v38 = vmul.f32 %v250_v33, %v250_v33 }
  0xcf   : > { %v262_v39 = vadd.f32 %v254_v36, %v253_v35 }
  0xd0   : > { %v268_v40 = vadd.f32 %v258_v38, %v257_v37 }
  0xd1   : > { %266 = vadd.xlane.f32.xlu0 %v265_v34  ;;  %263 = vadd.xlane.f32.xlu1 %v262_v39 }
  0xd5   : > { %269 = vadd.xlane.f32.xlu1 %v268_v40 }
  0xe6   : > { %433 = vrot.lane.b32.xlu1 %v1600_v45, %s1398_s26 }
  0xe7   : > { %435 = vrot.lane.b32.xlu0 %v1604_v47, %s1398_s26 }
  0xea   : > { %437 = vrot.lane.b32.xlu1 %v1608_v48, %s1398_s26 }
  0xeb   : > { %443 = vrot.lane.b32.xlu0 %v1612_v49, %s1398_s26 }
  0xee   : > { %439 = vrot.lane.b32.xlu1 %v1616_v50, %s1398_s26 }
  0xef   : > { %447 = vrot.lane.b32.xlu0 %v1620_v51, %s1398_s26 }
  0xf2   : > { %441 = vrot.lane.b32.xlu1 %v1624_v52, %s1398_s26 }
  0xf3   : > { %469 = vperm.xlu0 %1238, %v1630_v53  }
  0xf6   : > { %445 = vrot.lane.b32.xlu1 %v1634_v54, %s1398_s26  ;;  %s1415_s26 = smov 111  }
  0xf7   : > { %490 = vrot.lane.b32.xlu0 %v1553_v0, %s1399_s23 }
  0xf8   : > { %1239 = vset.pattern.permute.xlu0 %v1400_v56 }
  0xfa   : > { %464 = vperm.xlu1 %1237, %v1641_v55  }
  0xfb   : > { %494 = vrot.lane.b32.xlu0 %v1559_v2, %s1399_s23 }
  0xfe   : > { %474 = vperm.xlu1 %1237, %v1649_v57  }
  0xff   : > { %498 = vrot.lane.b32.xlu0 %v1556_v1, %s1399_s23 }
 0x102   : > { %479 = vperm.xlu1 %1237, %v1657_v58  }
 0x103   : > { %502 = vrot.lane.b32.xlu0 %v1564_v4, %s1399_s23 }
 0x106   : > { %492 = vrot.lane.b32.xlu1 %v1567_v5, %s1399_s23 }
 0x107   : > { %1240 = vset.pattern.permute.xlu1 %v1400_v56  ;;  %516 = vperm.xlu0 %1239, %v1641_v55  }
 0x10a   : > { %496 = vrot.lane.b32.xlu1 %v1575_v8, %s1399_s23 }
 0x10b   : > { %528 = vperm.xlu0 %1239, %v1657_v58  }
 0x10e   : > { %500 = vrot.lane.b32.xlu1 %v1570_v6, %s1399_s23 }
 0x10f   : > { %549 = vrot.lane.b32.xlu0 %v1677_v60, %s1401_s6 }
 0x110   : > { %1242 = vset.pattern.permute.xlu0 %v1402_v62 }
 0x112   : > { %504 = vrot.lane.b32.xlu1 %v1578_v9, %s1399_s23 }
 0x113   : > { %553 = vrot.lane.b32.xlu0 %v1685_v61, %s1401_s6 }
 0x116   : > { %520 = vperm.xlu1 %1240, %v1630_v53  }
 0x117   : > { %557 = vrot.lane.b32.xlu0 %v1697_v3, %s1401_s6 }
 0x11a   : > { %524 = vperm.xlu1 %1240, %v1649_v57  }
 0x11b   : > { %561 = vrot.lane.b32.xlu0 %v1704_v7, %s1401_s6 }
 0x11e   : > { %547 = vrot.lane.b32.xlu1 %v1710_v10, %s1401_s6 }
 0x11f   : > { %1241 = vset.pattern.permute.xlu1 %v1402_v62  ;;  %577 = vperm.xlu0 %1242, %v1630_v53  }
 0x122   : > { %551 = vrot.lane.b32.xlu1 %v1717_v11, %s1401_s6 }
 0x123   : > { %616 = vrot.lane.b32.xlu0 %v1600_v45, %s1403_s7 }
 0x124   : > { %1243 = vset.pattern.permute.xlu0 %v1404_v13 }
 0x126   : > { %555 = vrot.lane.b32.xlu1 %v1724_v12, %s1401_s6 }
 0x127   : > { %620 = vrot.lane.b32.xlu0 %v1608_v48, %s1403_s7 }
 0x12a   : > { %559 = vrot.lane.b32.xlu1 %v1732_v14, %s1401_s6  ;;  %s1410_s6 = smov 2  }
 0x12e   : > { %573 = vperm.xlu1 %1241, %v1641_v55  }
 0x132   : > { %581 = vperm.xlu1 %1241, %v1649_v57  }
 0x136   : > { %585 = vperm.xlu1 %1241, %v1657_v58  }
 0x13a   : > { %618 = vrot.lane.b32.xlu1 %v1604_v47, %s1403_s7 }
 0x13b   : > { %1244 = vset.pattern.permute.xlu1 %v1404_v13 }
 0x13e   : > { %622 = vrot.lane.b32.xlu1 %v1616_v50, %s1403_s7 }
 0x142   : > { %626 = vrot.lane.b32.xlu1 %v1612_v49, %s1403_s7 }
 0x146   : > { %630 = vrot.lane.b32.xlu1 %v1620_v51, %s1403_s7 }
 0x14a   : > { %646 = vperm.xlu1 %1244, %v1630_v53  }
 0x14e   : > { %650 = vperm.xlu1 %1244, %v1649_v57  }
 0x152   : > { %1245 = vset.pattern.permute.xlu1 %v2351_v15 }
 0x153   : > { %666 = vperm.xlu1 %1245, %v1641_v55  }
 0x156   : > { %v261_v16 = vpop.xlane.xlu0 %260 }
 0x157   : > { %674 = vperm.xlu1 %1245, %v1649_v57   ;;  %v1753_v17 = vmul.f32 0.003921569, %v261_v16 }
 0x159   : > { %v275_v22 = vmul.f32 %v1753_v17, %v1753_v17 }
 0x15a   : > { %v264_v18 = vpop.xlane.xlu1 %263  ;;  %v267_v19 = vpop.xlane.xlu0 %266 }
 0x15b   : > { %v1755_v20 = vmul.f32 0.003921569, %v264_v18  ;;  %v1757_v21 = vmul.f32 0.003921569, %v267_v19  ;;  %678 = vperm.xlu1 %1245, %v1657_v58  }
 0x15d   : > { %v276_v23 = vmul.f32 %v1755_v20, %v1755_v20  ;;  %v277_v27 = vmul.f32 %v1757_v21, %v1757_v21 }
 0x15e   : > { %v270_v24 = vpop.xlane.xlu1 %269  ;;  %v436_v25 = vpop.permute.xlu0 %435 }
 0x15f   : > { %v279_v26 = vadd.f32 %v276_v23, %v275_v22  ;;  %v1766_v28 = vmul.f32 0.003921569, %v270_v24  ;;  %699 = vrot.lane.b32.xlu1 %v1677_v60, %s1406_s9 }
 0x160   : > { %1246 = vset.pattern.permute.xlu1 %v2353_v29 }
 0x161   : > { %v280_v30 = vadd.f32 %v279_v26, %v277_v27  ;;  %v278_v31 = vmul.f32 %v1766_v28, %v1766_v28 }
 0x162   : > { %v1773_v32 = vpop.permute.xlu1 %433  ;;  %v444_v33 = vpop.permute.xlu0 %443 }
 0x163   : > { %v281_v34 = vadd.f32 %v280_v30, %v278_v31  ;;  %703 = vrot.lane.b32.xlu1 %v1685_v61, %s1406_s9  ;;  %v455_v46 = vsel %vm449_vm4, %v444_v33, %v436_v25  ;;  %v451_v59 = vsel %vm449_vm4, %v436_v25, %v444_v33  ;;  %v2354_v25 = vmov 6  }
 0x165   : > { %v282_v35 = vrot.slane %v281_v34, 4 }
 0x166   : > { %v1777_v36 = vpop.permute.xlu1 %437  ;;  %v448_v38 = vpop.permute.xlu0 %447 }
 0x167   : > { %v283_v37 = vadd.f32 %v282_v35, %v281_v34  ;;  %707 = vrot.lane.b32.xlu1 %v1697_v3, %s1406_s9 }
 0x169   : > { %v284_v39 = vrot.slane %v283_v37, 2 }
 0x16a   : > { %v440_v40 = vpop.permute.xlu1 %439 }
 0x16b   : > { %v285_v43 = vadd.f32 %v284_v39, %v283_v37  ;;  %711 = vrot.lane.b32.xlu1 %v1704_v7, %s1406_s9 }
 0x16d   : > { %v286_v56 = vrot.slane %v285_v43, 1 }
 0x16e   : > { %v1788_v62 = vpop.permute.xlu1 %441  ;;  %v470_v63 = vpop.permute.xlu0 %469 }
 0x16f   : > { %v287_v13 = vadd.f32 %v286_v56, %v285_v43  ;;  %v1790_v16 = vmul.f32 %v470_v63, %v455_v46  ;;  %727 = vperm.xlu1 %1246, %v1630_v53   ;;  %v1793_v18 = vmul.f32 %v470_v63, %v451_v59  ;;  %v2359_v56 = vmov 7  }
 0x171   : > { %1256 = vrsqrt.f32 %v287_v13  ;;  %vm290_vm6 = vcmp.eq.f32.partialorder %v287_v13, inf  ;;  %v293_v43 = vand.u32 2147483648, %v287_v13  ;;  %vm292_vm7 = vcmp.eq.f32.partialorder %v287_v13, 0.0 }
 0x172   : > { %v1795_v19 = vpop.permute.xlu1 %445  ;;  %v491_v22 = vpop.permute.xlu0 %490 }
 0x173   : > { %731 = vperm.xlu1 %1246, %v1649_v57  }
 0x176   : > { %v1798_v23 = vpop.permute.xlu1 %464  ;;  %v495_v24 = vpop.permute.xlu0 %494 }
 0x177   : > { %1248 = vset.pattern.permute.xlu1 %v2354_v25 }
 0x178   : > { %792 = vperm.xlu1 %1248, %v1630_v53  }
 0x17a   : > { %v1802_v26 = vpop.permute.xlu1 %474  ;;  %v499_v27 = vpop.permute.xlu0 %498 }
 0x17b   : > { %v507_v30 = vsel %vm506_vm5, %v491_v22, %v499_v27  ;;  %v511_v31 = vsel %vm506_vm5, %v499_v27, %v491_v22 }
 0x17c   : > { %796 = vperm.xlu1 %1248, %v1649_v57  }
 0x17e   : > { %v1257_v33 = vpop.eup %1256  ;;  %v480_v34 = vpop.permute.xlu1 %479 }
 0x17f   : > { %v503_v35 = vpop.permute.xlu0 %502  ;;  %v289_v37 = vmul.f32 %v1257_v33, %v287_v13 }
 0x180   : > { %v1812_v39 = vsel %vm506_vm5, %v495_v24, %v503_v35  ;;  %v1816_v46 = vsel %vm506_vm5, %v503_v35, %v495_v24  ;;  %1249 = vset.pattern.permute.xlu1 %v2359_v56  ;;  %v453_v24 = vsel %vm449_vm4, %v440_v40, %v448_v38  ;;  %v457_v35 = vsel %vm449_vm4, %v448_v38, %v440_v40  ;;  %v1837_v38 = vld [vmem:[%s2345_s1] sm:$0xff]  ;;  %v1842_v40 = vld [vmem:[%s2345_s1 + $0x8] sm:$0xff] }
 0x181   : > { %v291_v59 = vsel %vm290_vm6, %v287_v13, %v289_v37  ;;  %v488_v13 = vmul.f32 %v480_v34, %v457_v35  ;;  %v489_v37 = vmul.f32 %v480_v34, %v453_v24 }
 0x182   : > { %v294_v63 = vsel %vm292_vm7, %v293_v43, %v291_v59  ;;  %v493_v22 = vpop.permute.xlu1 %492 }
 0x183   : > { %v517_v27 = vpop.permute.xlu0 %516  ;;  %v295_v15 = vmax.f32 %v294_v63, 1e-12 }
 0x184   : > { %v1819_v33 = vmul.f32 %v517_v27, %v511_v31  ;;  %v1821_v29 = vmul.f32 %v517_v27, %v507_v30 }
 0x185   : > { %1258 = vrcp.f32 %v295_v15 }
 0x186   : > { %v497_v25 = vpop.permute.xlu1 %496 }
 0x187   : > { %v529_v41 = vpop.permute.xlu0 %528 }
 0x18a   : > { %v501_v44 = vpop.permute.xlu1 %500 }
 0x18b   : > { %v550_v7 = vpop.permute.xlu0 %549  ;;  %v512_v27 = vsel %vm506_vm5, %v501_v44, %v493_v22 }
 0x18e   : > { %v505_v43 = vpop.permute.xlu1 %504 }
 0x18f   : > { %v554_v59 = vpop.permute.xlu0 %553  ;;  %v510_v31 = vsel %vm506_vm5, %v497_v25, %v505_v43  ;;  %v514_v15 = vsel %vm506_vm5, %v505_v43, %v497_v25  ;;  %v508_v25 = vsel %vm506_vm5, %v493_v22, %v501_v44  ;;  %v1870_v44 = vld [vmem:[%s2345_s1 + $0x18] sm:$0xff] }
 0x190   : > { %v537_v30 = vmul.f32 %v529_v41, %v514_v15  ;;  %v538_v63 = vmul.f32 %v529_v41, %v510_v31  ;;  %v1847_v41 = vld [vmem:[%s2345_s1 + $0x10] sm:$0xff] }
 0x192   : > { %v1259_v56 = vpop.eup %1258  ;;  %v521_v34 = vpop.permute.xlu1 %520  ;;  %v1851_v24 = vadd.f32 %v537_v30, %v488_v13  ;;  %v1853_v35 = vadd.f32 %v538_v63, %v489_v37 }
 0x193   : > { %v558_v43 = vpop.permute.xlu0 %557  ;;  %v1856_v31 = vmul.f32 %v1259_v56, %v1753_v17  ;;  %v1859_v15 = vmul.f32 %v1259_v56, %v1755_v20  ;;  %v1862_v3 = vmul.f32 %v1259_v56, %v1757_v21  ;;  %v1865_v61 = vmul.f32 %v1259_v56, %v1766_v28 }
 0x194   : > { %v533_v22 = vmul.f32 %v521_v34, %v512_v27  ;;  %v565_v17 = vsel %vm563_vm8, %v550_v7, %v558_v43  ;;  %v569_v20 = vsel %vm563_vm8, %v558_v43, %v550_v7  ;;  %v534_v13 = vmul.f32 %v521_v34, %v508_v25 }
 0x195   : > { %2391 = vst [vmem:[#allocation17_spill] sm:$0xff] %v1856_v31  ;;  %2392 = vst [vmem:[#allocation18_spill] sm:$0xff] %v1859_v15  ;;  %v305_v21 = vmul.f32 %v1837_v38, %v1856_v31  ;;  %v306_v28 = vmul.f32 %v1842_v40, %v1859_v15  ;;  %v307_v56 = vmul.f32 %v1847_v41, %v1862_v3 }
 0x196   : > { %2393 = vst [vmem:[#allocation19_spill] sm:$0xff] %v1862_v3  ;;  %2394 = vst [vmem:[#allocation20_spill] sm:$0xff] %v1865_v61  ;;  %v525_v37 = vpop.permute.xlu1 %524  ;;  %v308_v63 = vmul.f32 %v1870_v44, %v1865_v61  ;;  %v541_v15 = vadd.f32 %v533_v22, %v1790_v16  ;;  %v542_v3 = vadd.f32 %v534_v13, %v1793_v18  ;;  %v2395_v13 = vlaneseq }
 0x197   : > { %v562_v30 = vpop.permute.xlu0 %561  ;;  %v310_v27 = vsel %vm309_vm9, %v305_v21, 0.0  ;;  %v311_v60 = vsel %vm309_vm9, %v306_v28, 0.0  ;;  %v313_v31 = vsel %vm309_vm9, %v307_v56, 0.0  ;;  %v450_v18 = vsel %vm449_vm4, %v1773_v32, %v1788_v62 }
 0x198   : > { %v312_v7 = vadd.f32 %v311_v60, %v310_v27  ;;  %v567_v43 = vsel %vm563_vm8, %v554_v59, %v562_v30  ;;  %v571_v25 = vsel %vm563_vm8, %v562_v30, %v554_v59  ;;  %v315_v21 = vsel %vm309_vm9, %v308_v63, 0.0 }
 0x199   : > { %v454_v59 = vsel %vm449_vm4, %v1788_v62, %v1773_v32  ;;  %v452_v22 = vsel %vm449_vm4, %v1777_v36, %v1795_v19  ;;  %v483_v62 = vmul.f32 %v1798_v23, %v450_v18  ;;  %v327_v30 = vshrl.u32 %v2395_v13, 7 }
 0x19a   : > { %v314_v34 = vadd.f32 %v313_v31, %v312_v7  ;;  %v548_v51 = vpop.permute.xlu1 %547  ;;  %v482_v32 = vmul.f32 %v1798_v23, %v454_v59 }
 0x19b   : > { %v578_v61 = vpop.permute.xlu0 %577  ;;  %v328_v18 = vsub.s32 0, %v327_v30 }
 0x19c   : > { %v590_v49 = vmul.f32 %v578_v61, %v569_v20  ;;  %v591_v28 = vmul.f32 %v578_v61, %v565_v17  ;;  %v316_v60 = vadd.f32 %v315_v21, %v314_v34  ;;  %v456_v17 = vsel %vm449_vm4, %v1795_v19, %v1777_v36 }
 0x19d   : > { %v486_v36 = vmul.f32 %v1802_v26, %v456_v17  ;;  %v487_v19 = vmul.f32 %v1802_v26, %v452_v22  ;;  %v539_v23 = vadd.f32 %v1819_v33, %v482_v32 }
 0x19e   : > { %v1894_v27 = vadd.f32 %v590_v49, %v541_v15  ;;  %v1896_v50 = vadd.f32 %v591_v28, %v542_v3  ;;  %v317_v56 = vrot.slane %v316_v60, 4  ;;  %v552_v6 = vpop.permute.xlu1 %551  ;;  %v540_v28 = vadd.f32 %v1821_v29, %v483_v62 }
 0x1a0   : > { %v318_v16 = vadd.f32 %v317_v56, %v316_v60  ;;  %v535_v60 = vmul.f32 %v525_v37, %v1816_v46  ;;  %v536_v56 = vmul.f32 %v525_v37, %v1812_v39 }
 0x1a2   : > { %v319_v31 = vrot.slane %v318_v16, 2  ;;  %v556_v61 = vpop.permute.xlu1 %555 }
 0x1a3   : > { %v564_v49 = vsel %vm563_vm8, %v548_v51, %v556_v61  ;;  %v568_v3 = vsel %vm563_vm8, %v556_v61, %v548_v51  ;;  %v323_v51 = vld [vmem:[%s2347_s3] sm:$0x1] }
 0x1a4   : > { %v320_v15 = vadd.f32 %v319_v31, %v318_v16 }
 0x1a6   : > { %v321_v20 = vrot.slane %v320_v15, 1  ;;  %v560_v63 = vpop.permute.xlu1 %559 }
 0x1a7   : > { %v566_v7 = vsel %vm563_vm8, %v552_v6, %v560_v63  ;;  %v570_v34 = vsel %vm563_vm8, %v560_v63, %v552_v6  ;;  %v543_v6 = vadd.f32 %v535_v60, %v486_v36  ;;  %v544_v63 = vadd.f32 %v536_v56, %v487_v19 }
 0x1a8   : > { %v322_v21 = vadd.f32 %v321_v20, %v320_v15 }
 0x1aa   : > { %v324_v16 = vadd.f32 %v323_v51, %v322_v21  ;;  %v574_v59 = vpop.permute.xlu1 %573 }
 0x1ab   : > { %v588_v31 = vmul.f32 %v574_v59, %v568_v3  ;;  %v589_v61 = vmul.f32 %v574_v59, %v564_v49 }
 0x1ac   : > { %v325_v13 = vmax.f32 %v324_v16, 0.0 }
 0x1ad   : > { %v1934_v17 = vadd.f32 %v588_v31, %v539_v23  ;;  %v1936_v26 = vadd.f32 %v589_v61, %v540_v28  ;;  %v2398_v31 = vmov 5  }
 0x1ae   : > { %v329_v15 = vrot.slane %v325_v13, %v328_v18  ;;  %v582_v33 = vpop.permute.xlu1 %581  ;;  %v2397_v18 = vmov 7  }
 0x1af   : > { %v592_v22 = vmul.f32 %v582_v33, %v570_v34  ;;  %v593_v29 = vmul.f32 %v582_v33, %v566_v7  ;;  %v2396_v34 = vmov 6  }
 0x1b0   : > { %331 = vrot.lane.b32.xlu0 %v329_v15, %s1410_s6  ;;  %s1334_s6 = scalar_lea.vmem %s1333_s5, 2048 }
 0x1b1   : > { %v1938_v46 = vadd.f32 %v592_v22, %v543_v6  ;;  %v1940_v39 = vadd.f32 %v593_v29, %v544_v63  ;;  %p1336_p7 = scmp.lt.s32.totalorder %s1334_s6, %s1328_s29 }
 0x1b2   : > { %v586_v37 = vpop.permute.xlu1 %585 }
 0x1b3   : > { %v594_v3 = vmul.f32 %v586_v37, %v571_v25  ;;  %v595_v49 = vmul.f32 %v586_v37, %v567_v43  ;;  %p1337_p8 = por %p1336_p7, %p1335_p5 }
 0x1b4   : > { %624 = vrot.lane.b32.xlu0 %v1624_v52, %s1403_s7 }
 0x1b5   : > { %v1945_v32 = vadd.f32 %v594_v3, %v1851_v24  ;;  %v1948_v62 = vadd.f32 %v595_v49, %v1853_v35  ;;  %v617_v3 = vpop.permute.xlu0 %616  ;;  %p1338_p10 = pnand %p1337_p8, %p1331_p4 }
 0x1b6   : > { %v619_v20 = vpop.permute.xlu1 %618 }
 0x1b8   : > { %628 = vrot.lane.b32.xlu0 %v1634_v54, %s1403_s7  ;;  %s1411_s7 = smov 126  }
 0x1b9   : > { %v621_v49 = vpop.permute.xlu0 %620 }
 0x1ba   : > { %v623_v30 = vpop.permute.xlu1 %622 }
 0x1bc   : > { %642 = vperm.xlu0 %1243, %v1641_v55  }
 0x1be   : > { %v627_v25 = vpop.permute.xlu1 %626 }
 0x1bf   : > { %v634_v43 = vsel %vm632_vm10, %v619_v20, %v627_v25  ;;  %v638_v24 = vsel %vm632_vm10, %v627_v25, %v619_v20 }
 0x1c0   : > { %654 = vperm.xlu0 %1243, %v1657_v58  }
 0x1c2   : > { %v631_v35 = vpop.permute.xlu1 %630 }
 0x1c3   : > { %v1961_v51 = vsel %vm632_vm10, %v623_v30, %v631_v35  ;;  %v1965_v7 = vsel %vm632_vm10, %v631_v35, %v623_v30 }
 0x1c4   : > { %697 = vrot.lane.b32.xlu0 %v1710_v10, %s1406_s9 }
 0x1c5   : > { %1247 = vset.pattern.permute.xlu0 %v2396_v34 }
 0x1c6   : > { %v647_v36 = vpop.permute.xlu1 %646 }
 0x1c7   : > { %v1970_v19 = vmul.f32 %v647_v36, %v638_v24  ;;  %v1972_v21 = vmul.f32 %v647_v36, %v634_v43 }
 0x1c8   : > { %701 = vrot.lane.b32.xlu0 %v1717_v11, %s1406_s9 }
 0x1ca   : > { %v651_v23 = vpop.permute.xlu1 %650 }
 0x1cc   : > { %705 = vrot.lane.b32.xlu0 %v1724_v12, %s1406_s9 }
 0x1ce   : > { %v667_v28 = vpop.permute.xlu1 %666 }
 0x1d0   : > { %709 = vrot.lane.b32.xlu0 %v1732_v14, %s1406_s9  ;;  %s1413_s9 = smov 113  }
 0x1d2   : > { %v675_v60 = vpop.permute.xlu1 %674 }
 0x1d3   : > { %v685_v34 = vmul.f32 %v675_v60, %v1559_v2  ;;  %v686_v36 = vmul.f32 %v675_v60, %v1564_v4  ;;  %v681_v60 = vmul.f32 %v667_v28, %v1553_v0 }
 0x1d4   : > { %788 = vperm.xlu0 %1247, %v1641_v55  }
 0x1d6   : > { %v679_v56 = vpop.permute.xlu1 %678 }
 0x1d8   : > { %800 = vperm.xlu0 %1247, %v1657_v58  }
 0x1da   : > { %v700_v16 = vpop.permute.xlu1 %699 }
 0x1dc   : > { %1250 = vset.pattern.permute.xlu0 %v2397_v18 }
 0x1dd   : > { %841 = vperm.xlu0 %1250, %v1630_v53  }
 0x1de   : > { %v704_v59 = vpop.permute.xlu1 %703 }
 0x1e1   : > { %1251 = vset.pattern.permute.xlu0 %v2398_v31 }
 0x1e2   : > { %v708_v61 = vpop.permute.xlu1 %707 }
 0x1e3   : > { %v715_v13 = vsel %vm713_vm11, %v700_v16, %v708_v61  ;;  %v719_v6 = vsel %vm713_vm11, %v708_v61, %v700_v16 }
 0x1e6   : > { %v712_v63 = vpop.permute.xlu1 %711 }
 0x1e7   : > { %v1992_v15 = vsel %vm713_vm11, %v704_v59, %v712_v63  ;;  %v1996_v33 = vsel %vm713_vm11, %v712_v63, %v704_v59  ;;  %v1412_v63 = vmov 8  }
 0x1ea   : > { %v728_v22 = vpop.permute.xlu1 %727 }
 0x1eb   : > { %v1998_v29 = vmul.f32 %v728_v22, %v715_v13  ;;  %v2000_v37 = vmul.f32 %v728_v22, %v719_v6  ;;  %v682_v22 = vmul.f32 %v667_v28, %v1556_v1 }
 0x222   : > { %v332_v20 = vpop.permute.xlu0 %331 }
 0x223   : > { %v337_v30 = vmul.f32 %v332_v20, %v1870_v44  ;;  %v334_v25 = vmul.f32 %v332_v20, %v1837_v38  ;;  %v335_v24 = vmul.f32 %v332_v20, %v1842_v40  ;;  %v336_v59 = vmul.f32 %v332_v20, %v1847_v41 }
 0x225   : > { %348 = vrot.lane.b32.xlu0 %v337_v30, %s1411_s7  ;;  %342 = vrot.lane.b32.xlu1 %v334_v25, %s1411_s7 }
 0x226   : > { %v625_v43 = vpop.permute.xlu0 %624 }
 0x227   : > { %v637_v20 = vsel %vm632_vm10, %v625_v43, %v617_v3 }
 0x229   : > { %723 = vperm.xlu0 %1251, %v1641_v55   ;;  %344 = vrot.lane.b32.xlu1 %v335_v24, %s1411_s7 }
 0x22a   : > { %v629_v35 = vpop.permute.xlu0 %628 }
 0x22b   : > { %v635_v16 = vsel %vm632_vm10, %v621_v49, %v629_v35  ;;  %v639_v18 = vsel %vm632_vm10, %v629_v35, %v621_v49  ;;  %v2399_v49 = vmov 4   ;;  %v688_v35 = vmul.f32 %v679_v56, %v1578_v9 }
 0x22c   : > { %v661_v31 = vmul.f32 %v651_v23, %v639_v18  ;;  %v662_v61 = vmul.f32 %v651_v23, %v635_v16  ;;  %v633_v23 = vsel %vm632_vm10, %v617_v3, %v625_v43 }
 0x22d   : > { %735 = vperm.xlu0 %1251, %v1657_v58   ;;  %346 = vrot.lane.b32.xlu1 %v336_v59, %s1411_s7 }
 0x22e   : > { %v693_v13 = vadd.f32 %v685_v34, %v661_v31  ;;  %v694_v6 = vadd.f32 %v686_v36, %v662_v61 }
 0x231   : > { %1253 = vset.pattern.permute.xlu0 %v1412_v63  ;;  %837 = vperm.xlu1 %1249, %v1641_v55  }
 0x232   : > { %902 = vperm.xlu0 %1253, %v1649_v57  }
 0x235   : > { %845 = vperm.xlu1 %1249, %v1649_v57   ;;  %v687_v57 = vmul.f32 %v679_v56, %v1575_v8 }
 0x236   : > { %1254 = vset.pattern.permute.xlu0 %v2399_v49 }
 0x237   : > { %670 = vperm.xlu0 %1254, %v1630_v53   ;;  %v643_v30 = vpop.permute.xlu0 %642 }
 0x238   : > { %v657_v25 = vmul.f32 %v643_v30, %v637_v20  ;;  %v658_v24 = vmul.f32 %v643_v30, %v633_v23 }
 0x239   : > { %849 = vperm.xlu1 %1249, %v1657_v58  }
 0x23a   : > { %v689_v28 = vadd.f32 %v681_v60, %v657_v25  ;;  %v690_v34 = vadd.f32 %v682_v22, %v658_v24 }
 0x23b   : > { %v655_v36 = vpop.permute.xlu0 %654  ;;  %764 = vrot.lane.b32.xlu0 %v1604_v47, %s1413_s9 }
 0x23c   : > { %v663_v3 = vmul.f32 %v655_v36, %v1965_v7  ;;  %v664_v43 = vmul.f32 %v655_v36, %v1961_v51  ;;  %v732_v7 = vpop.permute.xlu1 %731 }
 0x23d   : > { %1252 = vset.pattern.permute.xlu1 %v1412_v63 }
 0x23e   : > { %v695_v16 = vadd.f32 %v687_v57, %v663_v3  ;;  %v696_v18 = vadd.f32 %v688_v35, %v664_v43  ;;  %894 = vperm.xlu1 %1252, %v1641_v55  }
 0x23f   : > { %v698_v59 = vpop.permute.xlu0 %697 }
 0x240   : > { %v2057_v20 = vpop.permute.xlu1 %792 }
 0x242   : > { %898 = vperm.xlu1 %1252, %v1630_v53  }
 0x243   : > { %v702_v56 = vpop.permute.xlu0 %701 }
 0x244   : > { %v2061_v25 = vpop.permute.xlu1 %796 }
 0x246   : > { %906 = vperm.xlu1 %1252, %v1657_v58  }
 0x247   : > { %v706_v31 = vpop.permute.xlu0 %705 }
 0x248   : > { %v714_v61 = vsel %vm713_vm11, %v698_v59, %v706_v31  ;;  %v718_v47 = vsel %vm713_vm11, %v706_v31, %v698_v59 }
 0x24a   : > { %762 = vrot.lane.b32.xlu1 %v1600_v45, %s1413_s9  ;;  %v612_v45 = vsel %vm405_vm12, %v1938_v46, 0.0 }
 0x24b   : > { %v710_v51 = vpop.permute.xlu0 %709  ;;  %1255 = vset.pattern.permute.xlu1 %v2399_v49 }
 0x24c   : > { %v716_v53 = vsel %vm713_vm11, %v702_v56, %v710_v51  ;;  %v720_v55 = vsel %vm713_vm11, %v710_v51, %v702_v56  ;;  %v608_v51 = vsel %vm405_vm12, %v1934_v17, 0.0 }
 0x24d   : > { %v742_v58 = vmul.f32 %v732_v7, %v716_v53  ;;  %v743_v63 = vmul.f32 %v732_v7, %v720_v55 }
 0x24e   : > { %766 = vrot.lane.b32.xlu1 %v1608_v48, %s1413_s9 }
 0x24f   : > { %v750_v60 = vadd.f32 %v742_v58, %v693_v13  ;;  %v751_v22 = vadd.f32 %v743_v63, %v694_v6  ;;  %v2059_v30 = vpop.permute.xlu0 %788 }
 0x251   : > { %v2052_v49 = vadd.f32 %v750_v60, %v612_v45  ;;  %v2055_v23 = vadd.f32 %v751_v22, %v1940_v39 }
 0x253   : > { %v2063_v48 = vpop.permute.xlu0 %800 }
 0x258   : > { %v2066_v6 = vpop.permute.xlu0 %841 }
 0x297   : > { %v343_v24 = vpop.permute.xlu1 %342  ;;  %v349_v35 = vpop.permute.xlu0 %348 }
 0x298   : > { %v354_v13 = vsel %vm309_vm9, %v343_v24, 0.0  ;;  %v363_v43 = vsel %vm309_vm9, %v349_v35, 0.0 }
 0x299   : > { %355 = vadd.xlane.f32.xlu1 %v354_v13  ;;  %v2408_v13 = vld [vmem:[#allocation17_spill] sm:$0xff] }
 0x29b   : > { %v345_v46 = vpop.permute.xlu1 %344 }
 0x29c   : > { %v357_v57 = vsel %vm309_vm9, %v345_v46, 0.0 }
 0x29d   : > { %358 = vadd.xlane.f32.xlu0 %v357_v57 }
 0x29f   : > { %v347_v39 = vpop.permute.xlu1 %346 }
 0x2a0   : > { %v360_v36 = vsel %vm309_vm9, %v347_v39, 0.0 }
 0x2a1   : > { %361 = vadd.xlane.f32.xlu0 %v360_v36  ;;  %v2409_v36 = vld [vmem:[#allocation18_spill] sm:$0xff] }
 0x2a4   : > { %v724_v3 = vpop.permute.xlu0 %723 }
 0x2a5   : > { %v738_v59 = vmul.f32 %v724_v3, %v714_v61  ;;  %v739_v56 = vmul.f32 %v724_v3, %v718_v47  ;;  %364 = vadd.xlane.f32.xlu0 %v363_v43 }
 0x2a7   : > { %v746_v31 = vadd.f32 %v738_v59, %v689_v28  ;;  %v747_v7 = vadd.f32 %v739_v56, %v690_v34  ;;  %v614_v34 = vsel %vm405_vm12, %v1945_v32, 0.0 }
 0x2a8   : > { %v736_v53 = vpop.permute.xlu0 %735 }
 0x2a9   : > { %v744_v55 = vmul.f32 %v736_v53, %v1992_v15  ;;  %v745_v58 = vmul.f32 %v736_v53, %v1996_v33  ;;  %v2076_v63 = vadd.f32 %v746_v31, %v608_v51  ;;  %v2079_v60 = vadd.f32 %v747_v7, %v1936_v26  ;;  %v2400_v33 = vld [vmem:[#allocation8_spill] sm:$0xff]  ;;  %v2410_v31 = vld [vmem:[#allocation19_spill] sm:$0xff] }
 0x2aa   : > { %770 = vrot.lane.b32.xlu1 %v1624_v52, %s1413_s9 }
 0x2ab   : > { %v752_v61 = vadd.f32 %v744_v55, %v695_v16  ;;  %v753_v28 = vadd.f32 %v745_v58, %v696_v18  ;;  %v2411_v58 = vld [vmem:[#allocation20_spill] sm:$0xff] }
 0x2ad   : > { %v2086_v17 = vpop.permute.xlu0 %902  ;;  %v2088_v47 = vadd.f32 %v752_v61, %v614_v34  ;;  %v2091_v15 = vadd.f32 %v753_v28, %v1948_v62 }
 0x2ae   : > { %774 = vrot.lane.b32.xlu1 %v1634_v54, %s1413_s9  ;;  %v610_v54 = vsel %vm405_vm12, %v1894_v27, 0.0  ;;  %v2403_v27 = vld [vmem:[#allocation12_spill] sm:$0xff] }
 0x2b2   : > { %v671_v26 = vpop.permute.xlu0 %670  ;;  %811 = vrot.lane.b32.xlu1 %v1553_v0, %s1414_s20 }
 0x2b3   : > { %v683_v52 = vmul.f32 %v671_v26, %v1567_v5  ;;  %v684_v16 = vmul.f32 %v671_v26, %v2400_v33 }
 0x2b5   : > { %v691_v32 = vadd.f32 %v683_v52, %v1970_v19  ;;  %v692_v18 = vadd.f32 %v684_v16, %v1972_v21  ;;  %v2401_v19 = vld [vmem:[#allocation11_spill] sm:$0xff] }
 0x2b6   : > { %815 = vrot.lane.b32.xlu1 %v1559_v2, %s1414_s20  ;;  %v2402_v2 = vld [vmem:[#allocation10_spill] sm:$0xff] }
 0x2b7   : > { %v748_v62 = vadd.f32 %v1998_v29, %v691_v32  ;;  %v749_v22 = vadd.f32 %v2000_v37, %v692_v18  ;;  %v2143_v37 = vpop.permute.xlu0 %764 }
 0x2b9   : > { %v2106_v45 = vadd.f32 %v748_v62, %v610_v54  ;;  %v2109_v0 = vadd.f32 %v749_v22, %v1896_v50  ;;  %v2406_v50 = vld [vmem:[#allocation15_spill] sm:$0xff] }
 0x2ba   : > { %819 = vrot.lane.b32.xlu1 %v1556_v1, %s1414_s20  ;;  %v2404_v1 = vld [vmem:[#allocation13_spill] sm:$0xff] }
 0x2bb   : > { %768 = vrot.lane.b32.xlu0 %v2401_v19, %s1413_s9 }
 0x2be   : > { %823 = vrot.lane.b32.xlu1 %v1564_v4, %s1414_s20  ;;  %v2405_v4 = vld [vmem:[#allocation14_spill] sm:$0xff] }
 0x2bf   : > { %772 = vrot.lane.b32.xlu0 %v2402_v2, %s1413_s9 }
 0x2c2   : > { %868 = vrot.lane.b32.xlu1 %v1710_v10, %s1415_s26  ;;  %v2407_v10 = vld [vmem:[#allocation16_spill] sm:$0xff] }
 0x2c3   : > { %776 = vrot.lane.b32.xlu0 %v2403_v27, %s1413_s9 }
 0x2c6   : > { %872 = vrot.lane.b32.xlu1 %v1717_v11, %s1415_s26  ;;  %v2131_v11 = vpop.permute.xlu1 %837 }
 0x2c7   : > { %813 = vrot.lane.b32.xlu0 %v1567_v5, %s1414_s20 }
 0x2ca   : > { %876 = vrot.lane.b32.xlu1 %v1724_v12, %s1415_s26  ;;  %v846_v5 = vpop.permute.xlu1 %845 }
 0x2cb   : > { %817 = vrot.lane.b32.xlu0 %v1575_v8, %s1414_s20 }
 0x2ce   : > { %880 = vrot.lane.b32.xlu1 %v1732_v14, %s1415_s26  ;;  %v2133_v12 = vpop.permute.xlu1 %849 }
 0x2cf   : > { %821 = vrot.lane.b32.xlu0 %v2400_v33, %s1414_s20 }
 0x2d2   : > { %v2135_v8 = vpop.permute.xlu1 %894 }
 0x2d3   : > { %825 = vrot.lane.b32.xlu0 %v1578_v9, %s1414_s20 }
 0x2d6   : > { %v2137_v14 = vpop.permute.xlu1 %898 }
 0x2d7   : > { %870 = vrot.lane.b32.xlu0 %v2404_v1, %s1415_s26 }
 0x2da   : > { %v2139_v21 = vpop.permute.xlu1 %906 }
 0x2db   : > { %874 = vrot.lane.b32.xlu0 %v2405_v4, %s1415_s26 }
 0x2de   : > { %v2141_v9 = vpop.permute.xlu1 %762 }
 0x2df   : > { %878 = vrot.lane.b32.xlu0 %v2406_v50, %s1415_s26 }
 0x2e2   : > { %v767_v29 = vpop.permute.xlu1 %766 }
 0x2e3   : > { %882 = vrot.lane.b32.xlu0 %v2407_v10, %s1415_s26 }
 0x322   : > { %v356_v24 = vpop.xlane.xlu1 %355 }
 0x323   : > { %v366_v46 = vadd.f32 %v356_v24, %v2408_v13 }
 0x325   : > { %v370_v57 = vadd.f32 %v366_v46, %v1837_v38 }
 0x326   : > { %v2147_v39 = vpop.permute.xlu1 %770  ;;  %v359_v35 = vpop.xlane.xlu0 %358 }
 0x327   : > { %v367_v3 = vadd.f32 %v359_v35, %v2409_v36  ;;  %947 = vperm.xlu1 %1255, %v370_v57  }
 0x329   : > { %v371_v43 = vadd.f32 %v367_v3, %v1842_v40 }
 0x32a   : > { %v775_v59 = vpop.permute.xlu1 %774  ;;  %v362_v56 = vpop.xlane.xlu0 %361 }
 0x32b   : > { %v368_v7 = vadd.f32 %v362_v56, %v2410_v31  ;;  %952 = vperm.xlu0 %1254, %v371_v43   ;;  %v781_v19 = vsel %vm778_vm14, %v767_v29, %v775_v59  ;;  %v785_v2 = vsel %vm778_vm14, %v775_v59, %v767_v29 }
 0x32c   : > { %v807_v4 = vmul.f32 %v2061_v25, %v781_v19  ;;  %v808_v50 = vmul.f32 %v2061_v25, %v785_v2  ;;  %v2412_v25 = vld [vmem:[#allocation9_spill] sm:$0xff] }
 0x32d   : > { %v372_v51 = vadd.f32 %v368_v7, %v1847_v41  ;;  %vm408_vm0 = vcmp.lt.s32.totalorder %v2412_v25, 240 }
 0x32e   : > { %v2153_v53 = vpop.permute.xlu1 %811  ;;  %v365_v55 = vpop.xlane.xlu0 %364 }
 0x32f   : > { %v369_v38 = vadd.f32 %v365_v55, %v2411_v58  ;;  %957 = vperm.xlu1 %1255, %v372_v51  }
 0x331   : > { %v373_v61 = vadd.f32 %v369_v38, %v1870_v44 }
 0x332   : > { %v816_v28 = vpop.permute.xlu1 %815  ;;  %v2157_v34 = vpop.permute.xlu0 %768 }
 0x333   : > { %962 = vperm.xlu1 %1255, %v373_v61  }
 0x336   : > { %v820_v40 = vpop.permute.xlu1 %819  ;;  %v773_v26 = vpop.permute.xlu0 %772 }
 0x337   : > { %v780_v55 = vsel %vm778_vm14, %v2143_v37, %v773_v26  ;;  %v784_v58 = vsel %vm778_vm14, %v773_v26, %v2143_v37  ;;  %v832_v2 = vsel %vm827_vm13, %v820_v40, %v2153_v53 }
 0x338   : > { %v805_v61 = vmul.f32 %v2057_v20, %v780_v55 }
 0x33a   : > { %v824_v52 = vpop.permute.xlu1 %823  ;;  %v2159_v33 = vpop.permute.xlu0 %776 }
 0x33b   : > { %v830_v62 = vsel %vm827_vm13, %v816_v28, %v824_v52  ;;  %v834_v44 = vsel %vm827_vm13, %v824_v52, %v816_v28  ;;  %v806_v28 = vmul.f32 %v2057_v20, %v784_v58 }
 0x33c   : > { %v856_v27 = vmul.f32 %v846_v5, %v830_v62  ;;  %v857_v1 = vmul.f32 %v846_v5, %v834_v44 }
 0x33e   : > { %v869_v16 = vpop.permute.xlu1 %868  ;;  %v814_v32 = vpop.permute.xlu0 %813  ;;  %v864_v57 = vadd.f32 %v856_v27, %v807_v4  ;;  %v865_v35 = vadd.f32 %v857_v1, %v808_v50  ;;  %v783_v27 = vsel %vm778_vm14, %v2147_v39, %v2141_v9  ;;  %v828_v1 = vsel %vm827_vm13, %v2153_v53, %v820_v40 }
 0x33f   : > { %v804_v4 = vmul.f32 %v2059_v30, %v783_v27 }
 0x342   : > { %v873_v41 = vpop.permute.xlu1 %872  ;;  %v2161_v18 = vpop.permute.xlu0 %817 }
 0x346   : > { %v877_v22 = vpop.permute.xlu1 %876  ;;  %v822_v54 = vpop.permute.xlu0 %821 }
 0x347   : > { %v829_v31 = vsel %vm827_vm13, %v814_v32, %v822_v54  ;;  %v833_v7 = vsel %vm827_vm13, %v822_v54, %v814_v32  ;;  %v885_v50 = vsel %vm884_vm15, %v869_v16, %v877_v22 }
 0x348   : > { %v855_v38 = vmul.f32 %v2066_v6, %v833_v7  ;;  %v909_v53 = vmul.f32 %v2135_v8, %v885_v50 }
 0x34a   : > { %v881_v10 = vpop.permute.xlu1 %880  ;;  %v826_v24 = vpop.permute.xlu0 %825  ;;  %v863_v62 = vadd.f32 %v855_v38, %v806_v28 }
 0x34b   : > { %v887_v13 = vsel %vm884_vm15, %v873_v41, %v881_v10  ;;  %v891_v46 = vsel %vm884_vm15, %v881_v10, %v873_v41 }
 0x34c   : > { %v913_v29 = vmul.f32 %v2086_v17, %v887_v13  ;;  %v914_v5 = vmul.f32 %v2086_v17, %v891_v46  ;;  %v852_v13 = vmul.f32 %v2131_v11, %v828_v1 }
 0x34e   : > { %v921_v36 = vadd.f32 %v913_v29, %v864_v57  ;;  %v922_v3 = vadd.f32 %v914_v5, %v865_v35  ;;  %v871_v43 = vpop.permute.xlu0 %870 }
 0x350   : > { %v934_v59 = vsel %vm408_vm0, %v922_v3, 0.0  ;;  %v2186_v56 = vadd.f32 %v921_v36, %v2052_v49  ;;  %v854_v49 = vmul.f32 %v2066_v6, %v829_v31 }
 0x351   : > { %v2193_v51 = vadd.f32 %v934_v59, %v2055_v23 }
 0x352   : > { %v875_v17 = vpop.permute.xlu0 %874  ;;  %v862_v41 = vadd.f32 %v854_v49, %v805_v61 }
 0x356   : > { %v879_v52 = vpop.permute.xlu0 %878 }
 0x357   : > { %v886_v23 = vsel %vm884_vm15, %v871_v43, %v879_v52  ;;  %v890_v32 = vsel %vm884_vm15, %v879_v52, %v871_v43 }
 0x358   : > { %v911_v44 = vmul.f32 %v2137_v14, %v886_v23  ;;  %v912_v37 = vmul.f32 %v2137_v14, %v890_v32  ;;  %v889_v14 = vsel %vm884_vm15, %v877_v22, %v869_v16  ;;  %v782_v22 = vsel %vm778_vm14, %v2157_v34, %v2159_v33 }
 0x359   : > { %v910_v10 = vmul.f32 %v2135_v8, %v889_v14  ;;  %v809_v58 = vmul.f32 %v2063_v48, %v782_v22 }
 0x35a   : > { %v920_v26 = vadd.f32 %v912_v37, %v863_v62  ;;  %v919_v54 = vadd.f32 %v911_v44, %v862_v41  ;;  %v883_v29 = vpop.permute.xlu0 %882 }
 0x35b   : > { %v892_v8 = vsel %vm884_vm15, %v883_v29, %v875_v17  ;;  %v888_v36 = vsel %vm884_vm15, %v875_v17, %v883_v29 }
 0x35c   : > { %v932_v6 = vsel %vm408_vm0, %v920_v26, 0.0  ;;  %v939_v20 = vadd.f32 %v919_v54, %v2106_v45  ;;  %v853_v45 = vmul.f32 %v2131_v11, %v832_v2  ;;  %v786_v11 = vsel %vm778_vm14, %v2159_v33, %v2157_v34 }
 0x35d   : > { %v940_v19 = vadd.f32 %v932_v6, %v2109_v0  ;;  %v779_v0 = vsel %vm778_vm14, %v2141_v9, %v2147_v39  ;;  %v835_v9 = vsel %vm827_vm13, %v826_v24, %v2161_v18  ;;  %v810_v59 = vmul.f32 %v2063_v48, %v786_v11 }
 0x35e   : > { %v861_v46 = vadd.f32 %v853_v45, %v804_v4  ;;  %v803_v57 = vmul.f32 %v2059_v30, %v779_v0  ;;  %v831_v30 = vsel %vm827_vm13, %v2161_v18, %v826_v24  ;;  %v859_v16 = vmul.f32 %v2133_v12, %v835_v9 }
 0x35f   : > { %v858_v18 = vmul.f32 %v2133_v12, %v831_v30  ;;  %v916_v24 = vmul.f32 %v2139_v21, %v892_v8  ;;  %v915_v34 = vmul.f32 %v2139_v21, %v888_v36 }
 0x360   : > { %v918_v40 = vadd.f32 %v910_v10, %v861_v46  ;;  %v860_v35 = vadd.f32 %v852_v13, %v803_v57  ;;  %v867_v49 = vadd.f32 %v859_v16, %v810_v59 }
 0x361   : > { %v866_v17 = vadd.f32 %v858_v18, %v809_v58 }
 0x362   : > { %v917_v5 = vadd.f32 %v909_v53, %v860_v35  ;;  %v930_v39 = vsel %vm408_vm0, %v918_v40, 0.0 }
 0x363   : > { %v938_v43 = vadd.f32 %v930_v39, %v2079_v60  ;;  %v923_v12 = vadd.f32 %v915_v34, %v866_v17 }
 0x364   : > { %v937_v3 = vadd.f32 %v917_v5, %v2076_v63  ;;  %v924_v63 = vadd.f32 %v916_v24, %v867_v49 }
 0x365   : > { %v943_v6 = vadd.f32 %v923_v12, %v2088_v47 }
 0x366   : > { %v936_v48 = vsel %vm408_vm0, %v924_v63, 0.0  ;;  %v1292_v63 = vld [vmem:[%s1546_s22] sm:$0xff] }
 0x367   : > { %v944_v27 = vadd.f32 %v936_v48, %v2091_v15  ;;  %v1294_v48 = vld [vmem:[%s1546_s22 + $0x10] sm:$0xff] }
 0x3a2   : > { %v948_v31 = vpop.permute.xlu1 %947 }
 0x3a3   : > { %v965_v7 = vadd.f32 %v948_v31, %v937_v3  ;;  %v966_v55 = vadd.f32 %v948_v31, %v938_v43 }
 0x3a5   : > { %v973_v42 = vmax.f32 %v965_v7, -60.0  ;;  %v974_v33 = vmax.f32 %v966_v55, -60.0 }
 0x3a6   : > { %v953_v38 = vpop.permute.xlu0 %952 }
 0x3a7   : > { %v981_v60 = vsub.f32 0.0, %v973_v42  ;;  %v982_v61 = vsub.f32 0.0, %v974_v33  ;;  %v967_v28 = vadd.f32 %v953_v38, %v939_v20  ;;  %v968_v52 = vadd.f32 %v953_v38, %v940_v19 }
 0x3a9   : > { %v989_v23 = vmul.f32 1.442695, %v981_v60  ;;  %v991_v32 = vmul.f32 1.442695, %v982_v61  ;;  %v975_v41 = vmax.f32 %v967_v28, -60.0  ;;  %v976_v62 = vmax.f32 %v968_v52, -60.0 }
 0x3aa   : > { %v958_v44 = vpop.permute.xlu1 %957  ;;  %v1293_v28 = vld [vmem:[%s1546_s22 + $0x8] sm:$0xff] }
 0x3ab   : > { %1260 = vpow2.f32 %v989_v23  ;;  %v983_v21 = vsub.f32 0.0, %v975_v41  ;;  %v984_v37 = vsub.f32 0.0, %v976_v62  ;;  %v969_v26 = vadd.f32 %v958_v44, %v2186_v56 }
 0x3ac   : > { %1262 = vpow2.f32 %v991_v32  ;;  %v970_v54 = vadd.f32 %v958_v44, %v2193_v51 }
 0x3ad   : > { %v993_v20 = vmul.f32 1.442695, %v983_v21  ;;  %v995_v19 = vmul.f32 1.442695, %v984_v37  ;;  %v977_v2 = vmax.f32 %v969_v26, -60.0 }
 0x3ae   : > { %v978_v14 = vmax.f32 %v970_v54, -60.0  ;;  %v963_v1 = vpop.permute.xlu1 %962  ;;  %v1295_v54 = vld [vmem:[%s1546_s22 + $0x18] sm:$0xff] }
 0x3af   : > { %1264 = vpow2.f32 %v993_v20  ;;  %v985_v25 = vsub.f32 0.0, %v977_v2  ;;  %v971_v45 = vadd.f32 %v963_v1, %v943_v6  ;;  %v972_v0 = vadd.f32 %v963_v1, %v944_v27 }
 0x3b0   : > { %1266 = vpow2.f32 %v995_v19  ;;  %v986_v4 = vsub.f32 0.0, %v978_v14 }
 0x3b1   : > { %v997_v50 = vmul.f32 1.442695, %v985_v25  ;;  %v979_v56 = vmax.f32 %v971_v45, -60.0  ;;  %v980_v10 = vmax.f32 %v972_v0, -60.0  ;;  %v1296_v25 = vld [vmem:[%s1546_s22 + $0x20] sm:$0xff] }
 0x3b2   : > { %v999_v13 = vmul.f32 1.442695, %v986_v4  ;;  %v1297_v4 = vld [vmem:[%s1546_s22 + $0x28] sm:$0xff] }
 0x3b3   : > { %1268 = vpow2.f32 %v997_v50  ;;  %v987_v51 = vsub.f32 0.0, %v979_v56  ;;  %v988_v47 = vsub.f32 0.0, %v980_v10 }
 0x3b4   : > { %1270 = vpow2.f32 %v999_v13 }
 0x3b5   : > { %v1001_v46 = vmul.f32 1.442695, %v987_v51  ;;  %v1003_v57 = vmul.f32 1.442695, %v988_v47  ;;  %v1298_v51 = vld [vmem:[%s1546_s22 + $0x30] sm:$0xff] }
 0x3b7   : > { %1272 = vpow2.f32 %v1001_v46  ;;  %v1299_v46 = vld [vmem:[%s1546_s22 + $0x38] sm:$0xff] }
 0x3b8   : > { %v1261_v15 = vpop.eup %1260  ;;  %1274 = vpow2.f32 %v1003_v57 }
 0x3b9   : > { %v1263_v53 = vpop.eup %1262  ;;  %v1005_v40 = vadd.f32 1.0, %v1261_v15 }
 0x3ba   : > { %v1006_v35 = vadd.f32 1.0, %v1263_v53 }
 0x3bb   : > { %1276 = vrcp.f32 %v1005_v40 }
 0x3bc   : > { %v1265_v29 = vpop.eup %1264  ;;  %1278 = vrcp.f32 %v1006_v35 }
 0x3bd   : > { %v1267_v5 = vpop.eup %1266  ;;  %v1007_v9 = vadd.f32 1.0, %v1265_v29 }
 0x3be   : > { %v1008_v39 = vadd.f32 1.0, %v1267_v5 }
 0x3bf   : > { %1280 = vrcp.f32 %v1007_v9 }
 0x3c0   : > { %v1269_v11 = vpop.eup %1268  ;;  %1282 = vrcp.f32 %v1008_v39 }
 0x3c1   : > { %v1271_v30 = vpop.eup %1270  ;;  %v1009_v8 = vadd.f32 1.0, %v1269_v11 }
 0x3c2   : > { %v1010_v16 = vadd.f32 1.0, %v1271_v30 }
 0x3c3   : > { %1284 = vrcp.f32 %v1009_v8 }
 0x3c4   : > { %v1273_v22 = vpop.eup %1272  ;;  %1286 = vrcp.f32 %v1010_v16 }
 0x3c5   : > { %v1275_v36 = vpop.eup %1274  ;;  %v1011_v3 = vadd.f32 1.0, %v1273_v22 }
 0x3c6   : > { %v1012_v43 = vadd.f32 1.0, %v1275_v36 }
 0x3c7   : > { %1288 = vrcp.f32 %v1011_v3 }
 0x3c8   : > { %v1277_v59 = vpop.eup %1276  ;;  %1290 = vrcp.f32 %v1012_v43 }
 0x3c9   : > { %v1279_v18 = vpop.eup %1278  ;;  %v1021_v24 = vmul.f32 %v1277_v59, %v1005_v40 }
 0x3ca   : > { %v1022_v31 = vmul.f32 %v1279_v18, %v1006_v35 }
 0x3cb   : > { %v1029_v7 = vsub.f32 2.0, %v1021_v24 }
 0x3cc   : > { %v1281_v55 = vpop.eup %1280  ;;  %v1030_v58 = vsub.f32 2.0, %v1022_v31 }
 0x3cd   : > { %v1283_v49 = vpop.eup %1282  ;;  %v1037_v34 = vmul.f32 %v1277_v59, %v1029_v7  ;;  %v1023_v42 = vmul.f32 %v1281_v55, %v1007_v9 }
 0x3ce   : > { %v1038_v33 = vmul.f32 %v1279_v18, %v1030_v58  ;;  %v1024_v17 = vmul.f32 %v1283_v49, %v1008_v39 }
 0x3cf   : > { %v1045_v38 = vmul.f32 %v1292_v63, %v1037_v34  ;;  %v1031_v60 = vsub.f32 2.0, %v1023_v42 }
 0x3d0   : > { %v1285_v61 = vpop.eup %1284  ;;  %v1046_v52 = vmul.f32 %v1293_v28, %v1038_v33  ;;  %v1032_v12 = vsub.f32 2.0, %v1024_v17 }
 0x3d1   : > { %v1287_v23 = vpop.eup %1286  ;;  %1053 = vst [vmem:[%s2277_s8] sm:$0xff] %v1045_v38  ;;  %v1039_v32 = vmul.f32 %v1281_v55, %v1031_v60  ;;  %v1025_v41 = vmul.f32 %v1285_v61, %v1009_v8 }
 0x3d2   : > { %1054 = vst [vmem:[%s2277_s8 + $0x8] sm:$0xff] %v1046_v52  ;;  %v1040_v62 = vmul.f32 %v1283_v49, %v1032_v12  ;;  %v1026_v44 = vmul.f32 %v1287_v23, %v1010_v16 }
 0x3d3   : > { %v1047_v21 = vmul.f32 %v1294_v48, %v1039_v32  ;;  %v1033_v37 = vsub.f32 2.0, %v1025_v41 }
 0x3d4   : > { %v1289_v26 = vpop.eup %1288  ;;  %v1048_v6 = vmul.f32 %v1295_v54, %v1040_v62  ;;  %v1034_v20 = vsub.f32 2.0, %v1026_v44 }
 0x3d5   : > { %v1291_v19 = vpop.eup %1290  ;;  %1055 = vst [vmem:[%s2277_s8 + $0x10] sm:$0xff] %v1047_v21  ;;  %v1041_v2 = vmul.f32 %v1285_v61, %v1033_v37  ;;  %v1027_v27 = vmul.f32 %v1289_v26, %v1011_v3 }
 0x3d6   : > { %1056 = vst [vmem:[%s2277_s8 + $0x18] sm:$0xff] %v1048_v6  ;;  %v1042_v14 = vmul.f32 %v1287_v23, %v1034_v20  ;;  %v1028_v1 = vmul.f32 %v1291_v19, %v1012_v43 }
 0x3d7   : > { %v1049_v45 = vmul.f32 %v1296_v25, %v1041_v2  ;;  %v1035_v0 = vsub.f32 2.0, %v1027_v27 }
 0x3d8   : > { %v1050_v50 = vmul.f32 %v1297_v4, %v1042_v14  ;;  %v1036_v56 = vsub.f32 2.0, %v1028_v1 }
 0x3d9   : > { %1057 = vst [vmem:[%s2277_s8 + $0x20] sm:$0xff] %v1049_v45  ;;  %v1043_v10 = vmul.f32 %v1289_v26, %v1035_v0 }
 0x3da   : > { %1058 = vst [vmem:[%s2277_s8 + $0x28] sm:$0xff] %v1050_v50  ;;  %v1044_v13 = vmul.f32 %v1291_v19, %v1036_v56 }
 0x3db   : > { %v1051_v47 = vmul.f32 %v1298_v51, %v1043_v10 }
 0x3dc   : > { %v1052_v57 = vmul.f32 %v1299_v46, %v1044_v13 }
 0x3dd   : > { %1059 = vst [vmem:[%s2277_s8 + $0x30] sm:$0xff] %v1051_v47 }
 0x3de   : > { %1060 = vst [vmem:[%s2277_s8 + $0x38] sm:$0xff] %v1052_v57 }
 0x3df   : > { %1341 = shalt.err (!%p1338_p10)
}
 0x3e0   : > { %s1342_s22 = scalar_lea.hbm %s2295_s25, 1024  ;;  %s1346_s20 = scalar_lea.hbm %s2348_s4, 2048 }
 0x3e1   : > { %p1343_p0 = scmp.ne.s32.totalorder %s2295_s25, %s1342_s22  ;;  %p1347_p1 = scmp.lt.s32.totalorder %s2295_s25, %s2348_s4 }
 0x3e2   : > { %p1348_p3 = scmp.lt.s32.totalorder %s1346_s20, %s1342_s22 }
 0x3e3   : > { %p1344_p2 = pnand %p1343_p0, %p2413_p12 }
 0x3e4   : > { %p1349_p6 = por %p1348_p3, %p1347_p1 }
 0x3e5   : > { %p1345_p9 = pneg %p1344_p2 }
 0x3e7   : > { %p1350_p11 = pnand %p1349_p6, %p1345_p9 }
 0x3e9   : > { %1353 = shalt.err (!%p1350_p11)
}
 0x3ea   : > { %s1417_s14 = smov 256  }
 0x3eb   : > { %1171 = dma.vmem_to_hbm [thread:$0]  (%p2413_p12), %s2298_s10, 1024, %s2295_s25, %s1062_s19, %s1417_s14, %s1417_s14, %s1399_s23  }
 0x3ec PF: > { %s1091_s11 = sand.u32 1, %s1380_s15   ;;  %p2414_p13 = scmp.ne.s32.totalorder %s2375_s28, 0 }
 0x3ed   : > { %p2415_p4 = scmp.ge.s32.totalorder %s1392_s18, 2  ;;  %s1092_s12 = scalar_lea.sflag [#allocation4], %s1091_s11 }
 0x3ef   : > { %p1178_p5 = pnand %p2415_p4, %p2414_p13 }
 0x3f1   : > { %p1179_p7 = pneg %p1178_p5 }
 0x3f3   : > { %1375 = dma.done.wait (%p1179_p7), %s1092_s12, 1024  }
 0x3f4   : > { %1377 = vsyncadd (%p1179_p7), %s1092_s12, 4294966272  ;;  %p17_p8 = scmp.ge.s32.totalorder %s1468_s21, 4   ;;  %s2416_s15 = smov %s1384_s16 }
 0x3f5   : > { %s2417_s16 = smov %s1388_s17  ;;  %s2418_s17 = smov %s1480_s24 }
 0x3f6   : > { %s2419_s18 = smov %s1468_s21  ;;  %19 = sbr.rel (!%p17_p8) target bundleno = 5 (0x5), region = 81 }
 0x3fb   :  { %1097 = vsyncpa [#allocation3], 1 }
 0x3fc   :  { %1099 = vsyncpa [#allocation3 + $0x1], 1 }
 0x3fd   :  { %1100 = vsyncpa [#allocation4], 1 }
 0x3fe   :  { %1102 = vsyncpa [#allocation4 + $0x1], 1 }

</bundles_post_ra>
